<compile_context>
chip_gen: v7x
topology: tpu7x:2x2x1
jax: 0.10.0
libtpu: 0.0.40
codegen_flags: <defaults>
</compile_context>

<pallas_src>
import functools

import jax
import jax.numpy as jnp
from jax import lax
from jax.experimental import pallas as pl
from jax.experimental.pallas import tpu as pltpu


# Channel-parity blocks along the slab sublane axis, ordered so that every
# shift group below is a contiguous sublane range.
_SLAB_PARITIES = ((0, 0), (1, 0), (1, 1), (0, 1))
# (shift_h, shift_w, first parity index in _SLAB_PARITIES, number of parities)
_GROUPS = ((0, 0, 2, 1), (0, 1, 1, 2), (1, 0, 2, 2), (1, 1, 0, 4))


def _round_up(a, b):
    return -(-a // b) * b


def _pick_td(od, n, c4, mh, k, m, cout_p, in_bytes, budget=8 << 20, max_td=8):
    """Output-depth planes per grid step: VMEM-budgeted, >=2 parallel steps."""
    fixed = 2 * c4 * mh * in_bytes + k * m * in_bytes        # halo (2 bufs) + scratch
    per = 4 * c4 * mh * in_bytes + 2 * cout_p * m * 4        # body (2 bufs) + out (2 bufs)
    td = 1
    for t in range(1, max(1, min(od, max_td)) + 1):
        if fixed + t * per <= budget:
            td = t
    if n == 1 and od >= 2:
        td = min(td, (od + 1) // 2)  # keep >=2 grid steps so both v7x TCs get work
    return td


def _endown_kernel(body_ref, halo_ref, w_ref, b_ref, o_ref, sc_ref, *,
                   cin, ow, m, td):
    """Computes TD output depth planes of the strided 3x3x3 convolution."""
    w_mat = w_ref[...]                       # (cout_p, 27*cin), VMEM resident
    bias = b_ref[...]                        # (cout_p, 1)
    for r in range(td):                      # static unroll, TD is small
        # Gather the 27 tap windows of output plane r into the (27*cin, m)
        # scratch as 12 contiguous sublane x lane copies (4 shift groups x 3 kd).
        for kd in range(3):
            dz = 2 * r + kd
            dst = kd * 9 * cin
            for (sh, sw, plo, npar) in _GROUPS:
                rows = npar * cin
                off = sh * (ow + 1) + sw
                if dz < 2 * td:
                    win = body_ref[0, dz, plo * cin:plo * cin + rows, off:off + m]
                else:                        # depth halo plane (r == td-1, kd == 2)
                    win = halo_ref[0, 0, plo * cin:plo * cin + rows, off:off + m]
                sc_ref[dst:dst + rows, :] = win
                dst += rows
        # Single big-contraction MXU dot + bias; one lane-dense slab store.
        acc = jnp.dot(w_mat, sc_ref[...], preferred_element_type=jnp.float32)
        o_ref[0, r, :, :] = (acc + bias).astype(o_ref.dtype)


def endown_forward(x, weight, bias, *, stream_dtype=None):
    """x: (N, Cin, D, H, W); weight: (Cout, Cin, 3, 3, 3); bias: (Cout,).

    Returns nn.Conv3d(Cin, Cout, kernel_size=3, stride=2, padding=1)(x):
    shape (N, Cout, ceil(D/2), ceil(H/2), ceil(W/2)).
    """
    n, cin, d, h, w = x.shape
    cout = weight.shape[0]
    out_dtype = x.dtype

    # Odd spatial dims: zero-pad to even at the far end (numerically identical
    # to the conv's own zero padding for k=3, s=2, p=1).
    d2, h2, w2 = d + d % 2, h + h % 2, w + w % 2
    if (d2, h2, w2) != (d, h, w):
        x = jnp.pad(x, ((0, 0), (0, 0), (0, d2 - d), (0, h2 - h), (0, w2 - w)))
    od, oh, ow = d2 // 2, h2 // 2, w2 // 2

    c4 = 4 * cin
    m = oh * (ow + 1)               # GEMM free dim (one garbage column per row)
    mh = (oh + 2) * (ow + 1)        # slab lane extent (halo row top + bottom)
    k = 27 * cin                    # GEMM contraction dim
    cout_p = _round_up(cout, 8)

    in_bytes = jnp.dtype(stream_dtype) .itemsize if stream_dtype else jnp.dtype(x.dtype).itemsize
    td = _pick_td(od, n, c4, mh, k, m, cout_p, in_bytes)
    od_pad = _round_up(od, td)
    nblk = od_pad // td
    dq = 2 * od_pad + 1             # front depth halo + (possible) tail padding

    # ---- one fused repack of the input (single materialization of q) -------
    # (N,Cin,D2,OH,2,OW,2) -> (N,D2,parity4,Cin,OH,OW) -> reorder parities ->
    # pad halos -> flatten HW.  Parity reorder makes every tap group a
    # contiguous sublane range inside the kernel.
    xr = x.reshape(n, cin, 2 * od, oh, 2, ow, 2)
    xp = jnp.transpose(xr, (0, 2, 4, 6, 1, 3, 5)).reshape(n, 2 * od, 4, cin, oh, ow)
    xp = jnp.take(xp, jnp.array([0, 2, 3, 1]), axis=2)       # -> _SLAB_PARITIES
    xp = jnp.pad(xp, ((0, 0), (1, dq - 1 - 2 * od), (0, 0), (0, 0), (1, 1), (1, 0)))
    q = xp.reshape(n, dq, c4, mh)

    # Lane-dense weight matrix whose column order matches the scratch rows.
    cols = []
    for kd in range(3):
        for (sh, sw, plo, npar) in _GROUPS:
            for pi in range(plo, plo + npar):
                ph, pw = _SLAB_PARITIES[pi]
                cols.append(weight[:, :, kd, sh * (1 + ph), sw * (1 + pw)])
    w2d = jnp.concatenate(cols, axis=1)                       # (cout, 27*cin)
    w2d = jnp.pad(w2d, ((0, cout_p - cout), (0, 0)))
    b_col = jnp.pad(bias, (0, cout_p - cout)).reshape(cout_p, 1).astype(jnp.float32)

    if stream_dtype is not None:    # e.g. bf16 streaming on v6e/v7x
        q = q.astype(stream_dtype)
        w2d = w2d.astype(stream_dtype)

    kernel = functools.partial(_endown_kernel, cin=cin, ow=ow, m=m, td=td)

    flops = 2 * n * od_pad * cout_p * k * m
    bytes_accessed = int(q.size * q.dtype.itemsize * (2 * td + 1) / (2 * td)
                         + w2d.size * w2d.dtype.itemsize
                         + n * od_pad * cout_p * m * jnp.dtype(out_dtype).itemsize)

    out4 = pl.pallas_call(
        kernel,
        out_shape=jax.ShapeDtypeStruct((n, od_pad, cout_p, m), out_dtype),
        grid_spec=pltpu.PrefetchScalarGridSpec(
            num_scalar_prefetch=0,
            grid=(n, nblk),
            in_specs=[
                # body: the 2*TD input depth planes for this block of outputs
                pl.BlockSpec((1, 2 * td, c4, mh), lambda i, j: (i, j, 0, 0)),
                # halo: one extra plane shared with the next block
                pl.BlockSpec((1, 1, c4, mh),
                             lambda i, j: (i, 2 * td * (j + 1), 0, 0)),
                pl.BlockSpec((cout_p, k), lambda i, j: (0, 0)),
                pl.BlockSpec((cout_p, 1), lambda i, j: (0, 0)),
            ],
            out_specs=pl.BlockSpec((1, td, cout_p, m), lambda i, j: (i, j, 0, 0)),
            scratch_shapes=[pltpu.VMEM((k, m), q.dtype)],
        ),
        compiler_params=pltpu.CompilerParams(
            dimension_semantics=("parallel", "parallel")),
        cost_estimate=pl.CostEstimate(flops=flops, transcendentals=0,
                                      bytes_accessed=bytes_accessed),
    )(q, q, w2d, b_col)

    # Strip depth padding, per-row garbage column and Cout padding; -> NCDHW.
    out = out4[:, :od].reshape(n, od, cout_p, oh, ow + 1)[:, :, :cout, :, :ow]
    return jnp.transpose(out, (0, 2, 1, 3, 4))


if __name__ == "__main__":
    key = jax.random.PRNGKey(0)
    k_x, k_w, k_b = jax.random.split(key, 3)

    def reference(x, wgt, b):
        co = wgt.shape[0]
        return lax.conv_general_dilated(
            x, wgt, window_strides=(2, 2, 2),
            padding=((1, 1), (1, 1), (1, 1)),
            dimension_numbers=("NCDHW", "OIDHW", "NCDHW"),
        ) + b.reshape(1, co, 1, 1, 1)

    # Case 1: batch=2, in_c=4, ou_c=8, D=H=W=8 (module's toy size).
    N, Cin, Cout, D, H, W = 2, 4, 8, 8, 8, 8
    x = jax.random.normal(k_x, (N, Cin, D, H, W), dtype=jnp.float32)
    wgt = jax.random.normal(k_w, (Cout, Cin, 3, 3, 3), dtype=jnp.float32) * 0.1
    b = jax.random.normal(k_b, (Cout,), dtype=jnp.float32) * 0.1

    out = jax.block_until_ready(jax.jit(endown_forward)(x, wgt, b))
    ref = reference(x, wgt, b)
    assert out.shape == (N, Cout, 4, 4, 4), out.shape
    assert jnp.allclose(out, ref, atol=1e-4, rtol=1e-4), \
        float(jnp.max(jnp.abs(out - ref)))

    # Case 2: odd spatial dims + odd channel counts; single batch element, so
    # the depth axis is split into 2 parallel grid steps (both v7x TCs busy).
    N2, Ci2, Co2, Dd, Hh, Ww = 1, 3, 5, 7, 6, 5
    x2 = jax.random.normal(k_x, (N2, Ci2, Dd, Hh, Ww), dtype=jnp.float32)
    w2 = jax.random.normal(k_w, (Co2, Ci2, 3, 3, 3), dtype=jnp.float32) * 0.1
    b2 = jax.random.normal(k_b, (Co2,), dtype=jnp.float32) * 0.1

    out2 = jax.block_until_ready(jax.jit(endown_forward)(x2, w2, b2))
    ref2 = reference(x2, w2, b2)
    assert out2.shape == ref2.shape == (N2, Co2, 4, 3, 3), out2.shape
    assert jnp.allclose(out2, ref2, atol=1e-4, rtol=1e-4), \
        float(jnp.max(jnp.abs(out2 - ref2)))

    print("KERNEL_OK")
</pallas_src>

<mosaic_0001>
module attributes {stable_mosaic.version = 11 : i64} {
  func.func @_endown_kernel(%arg0: i32, %arg1: i32, %arg2: memref<1x8x16x30xf32, #tpu.memory_space<vmem>>, %arg3: memref<1x1x16x30xf32, #tpu.memory_space<vmem>>, %arg4: memref<8x108xf32, #tpu.memory_space<vmem>>, %arg5: memref<8x1xf32, #tpu.memory_space<vmem>>, %arg6: memref<1x4x8x20xf32, #tpu.memory_space<vmem>>, %arg7: memref<108x20xf32, #tpu.memory_space<vmem>>) attributes {dimension_semantics = [#tpu.dimension_semantics<parallel>, #tpu.dimension_semantics<parallel>], iteration_bounds = array<i64: 2, 1>, scalar_prefetch = 0 : i64, scratch_operands = 1 : i64, tpu.core_type = #tpu.core_type<tc>, window_params = [{transform_indices = @transform_0, window_bounds = array<i64: 1, 8, 16, 30>}, {transform_indices = @transform_1, window_bounds = array<i64: 1, 1, 16, 30>}, {pipeline_mode = #tpu.pipeline_mode<synchronous>, transform_indices = @transform_2, window_bounds = array<i64: 8, 108>}, {pipeline_mode = #tpu.pipeline_mode<synchronous>, transform_indices = @transform_3, window_bounds = array<i64: 8, 1>}, {transform_indices = @transform_4, window_bounds = array<i64: 1, 4, 8, 20>}]} {
    %c0 = arith.constant 0 : index
    %c0_0 = arith.constant 0 : index
    %0 = vector.load %arg4[%c0, %c0_0] : memref<8x108xf32, #tpu.memory_space<vmem>>, vector<8x108xf32>
    %c0_1 = arith.constant 0 : index
    %c0_2 = arith.constant 0 : index
    %1 = vector.load %arg5[%c0_1, %c0_2] : memref<8x1xf32, #tpu.memory_space<vmem>>, vector<8x1xf32>
    %c0_3 = arith.constant 0 : index
    %c0_4 = arith.constant 0 : index
    %c8 = arith.constant 8 : index
    %c0_5 = arith.constant 0 : index
    %2 = vector.load %arg2[%c0_3, %c0_4, %c8, %c0_5] : memref<1x8x16x30xf32, #tpu.memory_space<vmem>>, vector<1x1x4x20xf32>
    %3 = vector.shape_cast %2 : vector<1x1x4x20xf32> to vector<4x20xf32>
    %c0_6 = arith.constant 0 : index
    %c0_7 = arith.constant 0 : index
    %4 = vector.load %arg7[%c0_6, %c0_7] : memref<108x20xf32, #tpu.memory_space<vmem>>, vector<4x20xf32>
    tpu.vector_store %arg7[%c0_6, %c0_7], %3 {strides = array<i32>} : memref<108x20xf32, #tpu.memory_space<vmem>>, vector<4x20xf32>,
    %c0_8 = arith.constant 0 : index
    %c0_9 = arith.constant 0 : index
    %c4 = arith.constant 4 : index
    %c1 = arith.constant 1 : index
    %5 = vector.load %arg2[%c0_8, %c0_9, %c4, %c1] : memref<1x8x16x30xf32, #tpu.memory_space<vmem>>, vector<1x1x8x20xf32>
    %6 = vector.shape_cast %5 : vector<1x1x8x20xf32> to vector<8x20xf32>
    %c4_10 = arith.constant 4 : index
    %c0_11 = arith.constant 0 : index
    %7 = vector.load %arg7[%c4_10, %c0_11] : memref<108x20xf32, #tpu.memory_space<vmem>>, vector<8x20xf32>
    tpu.vector_store %arg7[%c4_10, %c0_11], %6 {strides = array<i32>} : memref<108x20xf32, #tpu.memory_space<vmem>>, vector<8x20xf32>,
    %c0_12 = arith.constant 0 : index
    %c0_13 = arith.constant 0 : index
    %c8_14 = arith.constant 8 : index
    %c5 = arith.constant 5 : index
    %8 = vector.load %arg2[%c0_12, %c0_13, %c8_14, %c5] : memref<1x8x16x30xf32, #tpu.memory_space<vmem>>, vector<1x1x8x20xf32>
    %9 = vector.shape_cast %8 : vector<1x1x8x20xf32> to vector<8x20xf32>
    %c12 = arith.constant 12 : index
    %c0_15 = arith.constant 0 : index
    %10 = vector.load %arg7[%c12, %c0_15] : memref<108x20xf32, #tpu.memory_space<vmem>>, vector<8x20xf32>
    tpu.vector_store %arg7[%c12, %c0_15], %9 {strides = array<i32>} : memref<108x20xf32, #tpu.memory_space<vmem>>, vector<8x20xf32>,
    %c0_16 = arith.constant 0 : index
    %c0_17 = arith.constant 0 : index
    %c0_18 = arith.constant 0 : index
    %c6 = arith.constant 6 : index
    %11 = vector.load %arg2[%c0_16, %c0_17, %c0_18, %c6] : memref<1x8x16x30xf32, #tpu.memory_space<vmem>>, vector<1x1x16x20xf32>
    %12 = vector.shape_cast %11 : vector<1x1x16x20xf32> to vector<16x20xf32>
    %c20 = arith.constant 20 : index
    %c0_19 = arith.constant 0 : index
    %13 = vector.load %arg7[%c20, %c0_19] : memref<108x20xf32, #tpu.memory_space<vmem>>, vector<16x20xf32>
    tpu.vector_store %arg7[%c20, %c0_19], %12 {strides = array<i32>} : memref<108x20xf32, #tpu.memory_space<vmem>>, vector<16x20xf32>,
    %c0_20 = arith.constant 0 : index
    %c1_21 = arith.constant 1 : index
    %c8_22 = arith.constant 8 : index
    %c0_23 = arith.constant 0 : index
    %14 = vector.load %arg2[%c0_20, %c1_21, %c8_22, %c0_23] : memref<1x8x16x30xf32, #tpu.memory_space<vmem>>, vector<1x1x4x20xf32>
    %15 = vector.shape_cast %14 : vector<1x1x4x20xf32> to vector<4x20xf32>
    %c36 = arith.constant 36 : index
    %c0_24 = arith.constant 0 : index
    %16 = vector.load %arg7[%c36, %c0_24] : memref<108x20xf32, #tpu.memory_space<vmem>>, vector<4x20xf32>
    tpu.vector_store %arg7[%c36, %c0_24], %15 {strides = array<i32>} : memref<108x20xf32, #tpu.memory_space<vmem>>, vector<4x20xf32>,
    %c0_25 = arith.constant 0 : index
    %c1_26 = arith.constant 1 : index
    %c4_27 = arith.constant 4 : index
    %c1_28 = arith.constant 1 : index
    %17 = vector.load %arg2[%c0_25, %c1_26, %c4_27, %c1_28] : memref<1x8x16x30xf32, #tpu.memory_space<vmem>>, vector<1x1x8x20xf32>
    %18 = vector.shape_cast %17 : vector<1x1x8x20xf32> to vector<8x20xf32>
    %c40 = arith.constant 40 : index
    %c0_29 = arith.constant 0 : index
    %19 = vector.load %arg7[%c40, %c0_29] : memref<108x20xf32, #tpu.memory_space<vmem>>, vector<8x20xf32>
    tpu.vector_store %arg7[%c40, %c0_29], %18 {strides = array<i32>} : memref<108x20xf32, #tpu.memory_space<vmem>>, vector<8x20xf32>,
    %c0_30 = arith.constant 0 : index
    %c1_31 = arith.constant 1 : index
    %c8_32 = arith.constant 8 : index
    %c5_33 = arith.constant 5 : index
    %20 = vector.load %arg2[%c0_30, %c1_31, %c8_32, %c5_33] : memref<1x8x16x30xf32, #tpu.memory_space<vmem>>, vector<1x1x8x20xf32>
    %21 = vector.shape_cast %20 : vector<1x1x8x20xf32> to vector<8x20xf32>
    %c48 = arith.constant 48 : index
    %c0_34 = arith.constant 0 : index
    %22 = vector.load %arg7[%c48, %c0_34] : memref<108x20xf32, #tpu.memory_space<vmem>>, vector<8x20xf32>
    tpu.vector_store %arg7[%c48, %c0_34], %21 {strides = array<i32>} : memref<108x20xf32, #tpu.memory_space<vmem>>, vector<8x20xf32>,
    %c0_35 = arith.constant 0 : index
    %c1_36 = arith.constant 1 : index
    %c0_37 = arith.constant 0 : index
    %c6_38 = arith.constant 6 : index
    %23 = vector.load %arg2[%c0_35, %c1_36, %c0_37, %c6_38] : memref<1x8x16x30xf32, #tpu.memory_space<vmem>>, vector<1x1x16x20xf32>
    %24 = vector.shape_cast %23 : vector<1x1x16x20xf32> to vector<16x20xf32>
    %c56 = arith.constant 56 : index
    %c0_39 = arith.constant 0 : index
    %25 = vector.load %arg7[%c56, %c0_39] : memref<108x20xf32, #tpu.memory_space<vmem>>, vector<16x20xf32>
    tpu.vector_store %arg7[%c56, %c0_39], %24 {strides = array<i32>} : memref<108x20xf32, #tpu.memory_space<vmem>>, vector<16x20xf32>,
    %c0_40 = arith.constant 0 : index
    %c2 = arith.constant 2 : index
    %c8_41 = arith.constant 8 : index
    %c0_42 = arith.constant 0 : index
    %26 = vector.load %arg2[%c0_40, %c2, %c8_41, %c0_42] : memref<1x8x16x30xf32, #tpu.memory_space<vmem>>, vector<1x1x4x20xf32>
    %27 = vector.shape_cast %26 : vector<1x1x4x20xf32> to vector<4x20xf32>
    %c72 = arith.constant 72 : index
    %c0_43 = arith.constant 0 : index
    %28 = vector.load %arg7[%c72, %c0_43] : memref<108x20xf32, #tpu.memory_space<vmem>>, vector<4x20xf32>
    tpu.vector_store %arg7[%c72, %c0_43], %27 {strides = array<i32>} : memref<108x20xf32, #tpu.memory_space<vmem>>, vector<4x20xf32>,
    %c0_44 = arith.constant 0 : index
    %c2_45 = arith.constant 2 : index
    %c4_46 = arith.constant 4 : index
    %c1_47 = arith.constant 1 : index
    %29 = vector.load %arg2[%c0_44, %c2_45, %c4_46, %c1_47] : memref<1x8x16x30xf32, #tpu.memory_space<vmem>>, vector<1x1x8x20xf32>
    %30 = vector.shape_cast %29 : vector<1x1x8x20xf32> to vector<8x20xf32>
    %c76 = arith.constant 76 : index
    %c0_48 = arith.constant 0 : index
    %31 = vector.load %arg7[%c76, %c0_48] : memref<108x20xf32, #tpu.memory_space<vmem>>, vector<8x20xf32>
    tpu.vector_store %arg7[%c76, %c0_48], %30 {strides = array<i32>} : memref<108x20xf32, #tpu.memory_space<vmem>>, vector<8x20xf32>,
    %c0_49 = arith.constant 0 : index
    %c2_50 = arith.constant 2 : index
    %c8_51 = arith.constant 8 : index
    %c5_52 = arith.constant 5 : index
    %32 = vector.load %arg2[%c0_49, %c2_50, %c8_51, %c5_52] : memref<1x8x16x30xf32, #tpu.memory_space<vmem>>, vector<1x1x8x20xf32>
    %33 = vector.shape_cast %32 : vector<1x1x8x20xf32> to vector<8x20xf32>
    %c84 = arith.constant 84 : index
    %c0_53 = arith.constant 0 : index
    %34 = vector.load %arg7[%c84, %c0_53] : memref<108x20xf32, #tpu.memory_space<vmem>>, vector<8x20xf32>
    tpu.vector_store %arg7[%c84, %c0_53], %33 {strides = array<i32>} : memref<108x20xf32, #tpu.memory_space<vmem>>, vector<8x20xf32>,
    %c0_54 = arith.constant 0 : index
    %c2_55 = arith.constant 2 : index
    %c0_56 = arith.constant 0 : index
    %c6_57 = arith.constant 6 : index
    %35 = vector.load %arg2[%c0_54, %c2_55, %c0_56, %c6_57] : memref<1x8x16x30xf32, #tpu.memory_space<vmem>>, vector<1x1x16x20xf32>
    %36 = vector.shape_cast %35 : vector<1x1x16x20xf32> to vector<16x20xf32>
    %c92 = arith.constant 92 : index
    %c0_58 = arith.constant 0 : index
    %37 = vector.load %arg7[%c92, %c0_58] : memref<108x20xf32, #tpu.memory_space<vmem>>, vector<16x20xf32>
    tpu.vector_store %arg7[%c92, %c0_58], %36 {strides = array<i32>} : memref<108x20xf32, #tpu.memory_space<vmem>>, vector<16x20xf32>,
    %c0_59 = arith.constant 0 : index
    %c0_60 = arith.constant 0 : index
    %38 = vector.load %arg7[%c0_59, %c0_60] : memref<108x20xf32, #tpu.memory_space<vmem>>, vector<108x20xf32>
    %cst = arith.constant dense<0.000000e+00> : vector<8x20xf32>
    %39 = tpu.matmul %0, %38, %cst {dimension_numbers = #tpu.dot_dimension_numbers<[1], [0], [0], [1], [0, 0, 1, 1], [], []>} : vector<8x108xf32>, vector<108x20xf32>, vector<8x20xf32> -> vector<8x20xf32>
    %40 = vector.broadcast %1 : vector<8x1xf32> to vector<8x20xf32>
    %41 = arith.addf %39, %40 : vector<8x20xf32>
    %c0_61 = arith.constant 0 : index
    %c0_62 = arith.constant 0 : index
    %c0_63 = arith.constant 0 : index
    %c0_64 = arith.constant 0 : index
    %42 = vector.load %arg6[%c0_61, %c0_62, %c0_63, %c0_64] : memref<1x4x8x20xf32, #tpu.memory_space<vmem>>, vector<1x1x8x20xf32>
    %43 = vector.shape_cast %42 : vector<1x1x8x20xf32> to vector<8x20xf32>
    %44 = vector.shape_cast %41 : vector<8x20xf32> to vector<1x1x8x20xf32>
    tpu.vector_store %arg6[%c0_61, %c0_62, %c0_63, %c0_64], %44 {strides = array<i32>} : memref<1x4x8x20xf32, #tpu.memory_space<vmem>>, vector<1x1x8x20xf32>,
    %c0_65 = arith.constant 0 : index
    %c2_66 = arith.constant 2 : index
    %c8_67 = arith.constant 8 : index
    %c0_68 = arith.constant 0 : index
    %45 = vector.load %arg2[%c0_65, %c2_66, %c8_67, %c0_68] : memref<1x8x16x30xf32, #tpu.memory_space<vmem>>, vector<1x1x4x20xf32>
    %46 = vector.shape_cast %45 : vector<1x1x4x20xf32> to vector<4x20xf32>
    %c0_69 = arith.constant 0 : index
    %c0_70 = arith.constant 0 : index
    %47 = vector.load %arg7[%c0_69, %c0_70] : memref<108x20xf32, #tpu.memory_space<vmem>>, vector<4x20xf32>
    tpu.vector_store %arg7[%c0_69, %c0_70], %46 {strides = array<i32>} : memref<108x20xf32, #tpu.memory_space<vmem>>, vector<4x20xf32>,
    %c0_71 = arith.constant 0 : index
    %c2_72 = arith.constant 2 : index
    %c4_73 = arith.constant 4 : index
    %c1_74 = arith.constant 1 : index
    %48 = vector.load %arg2[%c0_71, %c2_72, %c4_73, %c1_74] : memref<1x8x16x30xf32, #tpu.memory_space<vmem>>, vector<1x1x8x20xf32>
    %49 = vector.shape_cast %48 : vector<1x1x8x20xf32> to vector<8x20xf32>
    %c4_75 = arith.constant 4 : index
    %c0_76 = arith.constant 0 : index
    %50 = vector.load %arg7[%c4_75, %c0_76] : memref<108x20xf32, #tpu.memory_space<vmem>>, vector<8x20xf32>
    tpu.vector_store %arg7[%c4_75, %c0_76], %49 {strides = array<i32>} : memref<108x20xf32, #tpu.memory_space<vmem>>, vector<8x20xf32>,
    %c0_77 = arith.constant 0 : index
    %c2_78 = arith.constant 2 : index
    %c8_79 = arith.constant 8 : index
    %c5_80 = arith.constant 5 : index
    %51 = vector.load %arg2[%c0_77, %c2_78, %c8_79, %c5_80] : memref<1x8x16x30xf32, #tpu.memory_space<vmem>>, vector<1x1x8x20xf32>
    %52 = vector.shape_cast %51 : vector<1x1x8x20xf32> to vector<8x20xf32>
    %c12_81 = arith.constant 12 : index
    %c0_82 = arith.constant 0 : index
    %53 = vector.load %arg7[%c12_81, %c0_82] : memref<108x20xf32, #tpu.memory_space<vmem>>, vector<8x20xf32>
    tpu.vector_store %arg7[%c12_81, %c0_82], %52 {strides = array<i32>} : memref<108x20xf32, #tpu.memory_space<vmem>>, vector<8x20xf32>,
    %c0_83 = arith.constant 0 : index
    %c2_84 = arith.constant 2 : index
    %c0_85 = arith.constant 0 : index
    %c6_86 = arith.constant 6 : index
    %54 = vector.load %arg2[%c0_83, %c2_84, %c0_85, %c6_86] : memref<1x8x16x30xf32, #tpu.memory_space<vmem>>, vector<1x1x16x20xf32>
    %55 = vector.shape_cast %54 : vector<1x1x16x20xf32> to vector<16x20xf32>
    %c20_87 = arith.constant 20 : index
    %c0_88 = arith.constant 0 : index
    %56 = vector.load %arg7[%c20_87, %c0_88] : memref<108x20xf32, #tpu.memory_space<vmem>>, vector<16x20xf32>
    tpu.vector_store %arg7[%c20_87, %c0_88], %55 {strides = array<i32>} : memref<108x20xf32, #tpu.memory_space<vmem>>, vector<16x20xf32>,
    %c0_89 = arith.constant 0 : index
    %c3 = arith.constant 3 : index
    %c8_90 = arith.constant 8 : index
    %c0_91 = arith.constant 0 : index
    %57 = vector.load %arg2[%c0_89, %c3, %c8_90, %c0_91] : memref<1x8x16x30xf32, #tpu.memory_space<vmem>>, vector<1x1x4x20xf32>
    %58 = vector.shape_cast %57 : vector<1x1x4x20xf32> to vector<4x20xf32>
    %c36_92 = arith.constant 36 : index
    %c0_93 = arith.constant 0 : index
    %59 = vector.load %arg7[%c36_92, %c0_93] : memref<108x20xf32, #tpu.memory_space<vmem>>, vector<4x20xf32>
    tpu.vector_store %arg7[%c36_92, %c0_93], %58 {strides = array<i32>} : memref<108x20xf32, #tpu.memory_space<vmem>>, vector<4x20xf32>,
    %c0_94 = arith.constant 0 : index
    %c3_95 = arith.constant 3 : index
    %c4_96 = arith.constant 4 : index
    %c1_97 = arith.constant 1 : index
    %60 = vector.load %arg2[%c0_94, %c3_95, %c4_96, %c1_97] : memref<1x8x16x30xf32, #tpu.memory_space<vmem>>, vector<1x1x8x20xf32>
    %61 = vector.shape_cast %60 : vector<1x1x8x20xf32> to vector<8x20xf32>
    %c40_98 = arith.constant 40 : index
    %c0_99 = arith.constant 0 : index
    %62 = vector.load %arg7[%c40_98, %c0_99] : memref<108x20xf32, #tpu.memory_space<vmem>>, vector<8x20xf32>
    tpu.vector_store %arg7[%c40_98, %c0_99], %61 {strides = array<i32>} : memref<108x20xf32, #tpu.memory_space<vmem>>, vector<8x20xf32>,
    %c0_100 = arith.constant 0 : index
    %c3_101 = arith.constant 3 : index
    %c8_102 = arith.constant 8 : index
    %c5_103 = arith.constant 5 : index
    %63 = vector.load %arg2[%c0_100, %c3_101, %c8_102, %c5_103] : memref<1x8x16x30xf32, #tpu.memory_space<vmem>>, vector<1x1x8x20xf32>
    %64 = vector.shape_cast %63 : vector<1x1x8x20xf32> to vector<8x20xf32>
    %c48_104 = arith.constant 48 : index
    %c0_105 = arith.constant 0 : index
    %65 = vector.load %arg7[%c48_104, %c0_105] : memref<108x20xf32, #tpu.memory_space<vmem>>, vector<8x20xf32>
    tpu.vector_store %arg7[%c48_104, %c0_105], %64 {strides = array<i32>} : memref<108x20xf32, #tpu.memory_space<vmem>>, vector<8x20xf32>,
    %c0_106 = arith.constant 0 : index
    %c3_107 = arith.constant 3 : index
    %c0_108 = arith.constant 0 : index
    %c6_109 = arith.constant 6 : index
    %66 = vector.load %arg2[%c0_106, %c3_107, %c0_108, %c6_109] : memref<1x8x16x30xf32, #tpu.memory_space<vmem>>, vector<1x1x16x20xf32>
    %67 = vector.shape_cast %66 : vector<1x1x16x20xf32> to vector<16x20xf32>
    %c56_110 = arith.constant 56 : index
    %c0_111 = arith.constant 0 : index
    %68 = vector.load %arg7[%c56_110, %c0_111] : memref<108x20xf32, #tpu.memory_space<vmem>>, vector<16x20xf32>
    tpu.vector_store %arg7[%c56_110, %c0_111], %67 {strides = array<i32>} : memref<108x20xf32, #tpu.memory_space<vmem>>, vector<16x20xf32>,
    %c0_112 = arith.constant 0 : index
    %c4_113 = arith.constant 4 : index
    %c8_114 = arith.constant 8 : index
    %c0_115 = arith.constant 0 : index
    %69 = vector.load %arg2[%c0_112, %c4_113, %c8_114, %c0_115] : memref<1x8x16x30xf32, #tpu.memory_space<vmem>>, vector<1x1x4x20xf32>
    %70 = vector.shape_cast %69 : vector<1x1x4x20xf32> to vector<4x20xf32>
    %c72_116 = arith.constant 72 : index
    %c0_117 = arith.constant 0 : index
    %71 = vector.load %arg7[%c72_116, %c0_117] : memref<108x20xf32, #tpu.memory_space<vmem>>, vector<4x20xf32>
    tpu.vector_store %arg7[%c72_116, %c0_117], %70 {strides = array<i32>} : memref<108x20xf32, #tpu.memory_space<vmem>>, vector<4x20xf32>,
    %c0_118 = arith.constant 0 : index
    %c4_119 = arith.constant 4 : index
    %c4_120 = arith.constant 4 : index
    %c1_121 = arith.constant 1 : index
    %72 = vector.load %arg2[%c0_118, %c4_119, %c4_120, %c1_121] : memref<1x8x16x30xf32, #tpu.memory_space<vmem>>, vector<1x1x8x20xf32>
    %73 = vector.shape_cast %72 : vector<1x1x8x20xf32> to vector<8x20xf32>
    %c76_122 = arith.constant 76 : index
    %c0_123 = arith.constant 0 : index
    %74 = vector.load %arg7[%c76_122, %c0_123] : memref<108x20xf32, #tpu.memory_space<vmem>>, vector<8x20xf32>
    tpu.vector_store %arg7[%c76_122, %c0_123], %73 {strides = array<i32>} : memref<108x20xf32, #tpu.memory_space<vmem>>, vector<8x20xf32>,
    %c0_124 = arith.constant 0 : index
    %c4_125 = arith.constant 4 : index
    %c8_126 = arith.constant 8 : index
    %c5_127 = arith.constant 5 : index
    %75 = vector.load %arg2[%c0_124, %c4_125, %c8_126, %c5_127] : memref<1x8x16x30xf32, #tpu.memory_space<vmem>>, vector<1x1x8x20xf32>
    %76 = vector.shape_cast %75 : vector<1x1x8x20xf32> to vector<8x20xf32>
    %c84_128 = arith.constant 84 : index
    %c0_129 = arith.constant 0 : index
    %77 = vector.load %arg7[%c84_128, %c0_129] : memref<108x20xf32, #tpu.memory_space<vmem>>, vector<8x20xf32>
    tpu.vector_store %arg7[%c84_128, %c0_129], %76 {strides = array<i32>} : memref<108x20xf32, #tpu.memory_space<vmem>>, vector<8x20xf32>,
    %c0_130 = arith.constant 0 : index
    %c4_131 = arith.constant 4 : index
    %c0_132 = arith.constant 0 : index
    %c6_133 = arith.constant 6 : index
    %78 = vector.load %arg2[%c0_130, %c4_131, %c0_132, %c6_133] : memref<1x8x16x30xf32, #tpu.memory_space<vmem>>, vector<1x1x16x20xf32>
    %79 = vector.shape_cast %78 : vector<1x1x16x20xf32> to vector<16x20xf32>
    %c92_134 = arith.constant 92 : index
    %c0_135 = arith.constant 0 : index
    %80 = vector.load %arg7[%c92_134, %c0_135] : memref<108x20xf32, #tpu.memory_space<vmem>>, vector<16x20xf32>
    tpu.vector_store %arg7[%c92_134, %c0_135], %79 {strides = array<i32>} : memref<108x20xf32, #tpu.memory_space<vmem>>, vector<16x20xf32>,
    %c0_136 = arith.constant 0 : index
    %c0_137 = arith.constant 0 : index
    %81 = vector.load %arg7[%c0_136, %c0_137] : memref<108x20xf32, #tpu.memory_space<vmem>>, vector<108x20xf32>
    %cst_138 = arith.constant dense<0.000000e+00> : vector<8x20xf32>
    %82 = tpu.matmul %0, %81, %cst_138 {dimension_numbers = #tpu.dot_dimension_numbers<[1], [0], [0], [1], [0, 0, 1, 1], [], []>} : vector<8x108xf32>, vector<108x20xf32>, vector<8x20xf32> -> vector<8x20xf32>
    %83 = vector.broadcast %1 : vector<8x1xf32> to vector<8x20xf32>
    %84 = arith.addf %82, %83 : vector<8x20xf32>
    %c0_139 = arith.constant 0 : index
    %c1_140 = arith.constant 1 : index
    %c0_141 = arith.constant 0 : index
    %c0_142 = arith.constant 0 : index
    %85 = vector.load %arg6[%c0_139, %c1_140, %c0_141, %c0_142] : memref<1x4x8x20xf32, #tpu.memory_space<vmem>>, vector<1x1x8x20xf32>
    %86 = vector.shape_cast %85 : vector<1x1x8x20xf32> to vector<8x20xf32>
    %87 = vector.shape_cast %84 : vector<8x20xf32> to vector<1x1x8x20xf32>
    tpu.vector_store %arg6[%c0_139, %c1_140, %c0_141, %c0_142], %87 {strides = array<i32>} : memref<1x4x8x20xf32, #tpu.memory_space<vmem>>, vector<1x1x8x20xf32>,
    %c0_143 = arith.constant 0 : index
    %c4_144 = arith.constant 4 : index
    %c8_145 = arith.constant 8 : index
    %c0_146 = arith.constant 0 : index
    %88 = vector.load %arg2[%c0_143, %c4_144, %c8_145, %c0_146] : memref<1x8x16x30xf32, #tpu.memory_space<vmem>>, vector<1x1x4x20xf32>
    %89 = vector.shape_cast %88 : vector<1x1x4x20xf32> to vector<4x20xf32>
    %c0_147 = arith.constant 0 : index
    %c0_148 = arith.constant 0 : index
    %90 = vector.load %arg7[%c0_147, %c0_148] : memref<108x20xf32, #tpu.memory_space<vmem>>, vector<4x20xf32>
    tpu.vector_store %arg7[%c0_147, %c0_148], %89 {strides = array<i32>} : memref<108x20xf32, #tpu.memory_space<vmem>>, vector<4x20xf32>,
    %c0_149 = arith.constant 0 : index
    %c4_150 = arith.constant 4 : index
    %c4_151 = arith.constant 4 : index
    %c1_152 = arith.constant 1 : index
    %91 = vector.load %arg2[%c0_149, %c4_150, %c4_151, %c1_152] : memref<1x8x16x30xf32, #tpu.memory_space<vmem>>, vector<1x1x8x20xf32>
    %92 = vector.shape_cast %91 : vector<1x1x8x20xf32> to vector<8x20xf32>
    %c4_153 = arith.constant 4 : index
    %c0_154 = arith.constant 0 : index
    %93 = vector.load %arg7[%c4_153, %c0_154] : memref<108x20xf32, #tpu.memory_space<vmem>>, vector<8x20xf32>
    tpu.vector_store %arg7[%c4_153, %c0_154], %92 {strides = array<i32>} : memref<108x20xf32, #tpu.memory_space<vmem>>, vector<8x20xf32>,
    %c0_155 = arith.constant 0 : index
    %c4_156 = arith.constant 4 : index
    %c8_157 = arith.constant 8 : index
    %c5_158 = arith.constant 5 : index
    %94 = vector.load %arg2[%c0_155, %c4_156, %c8_157, %c5_158] : memref<1x8x16x30xf32, #tpu.memory_space<vmem>>, vector<1x1x8x20xf32>
    %95 = vector.shape_cast %94 : vector<1x1x8x20xf32> to vector<8x20xf32>
    %c12_159 = arith.constant 12 : index
    %c0_160 = arith.constant 0 : index
    %96 = vector.load %arg7[%c12_159, %c0_160] : memref<108x20xf32, #tpu.memory_space<vmem>>, vector<8x20xf32>
    tpu.vector_store %arg7[%c12_159, %c0_160], %95 {strides = array<i32>} : memref<108x20xf32, #tpu.memory_space<vmem>>, vector<8x20xf32>,
    %c0_161 = arith.constant 0 : index
    %c4_162 = arith.constant 4 : index
    %c0_163 = arith.constant 0 : index
    %c6_164 = arith.constant 6 : index
    %97 = vector.load %arg2[%c0_161, %c4_162, %c0_163, %c6_164] : memref<1x8x16x30xf32, #tpu.memory_space<vmem>>, vector<1x1x16x20xf32>
    %98 = vector.shape_cast %97 : vector<1x1x16x20xf32> to vector<16x20xf32>
    %c20_165 = arith.constant 20 : index
    %c0_166 = arith.constant 0 : index
    %99 = vector.load %arg7[%c20_165, %c0_166] : memref<108x20xf32, #tpu.memory_space<vmem>>, vector<16x20xf32>
    tpu.vector_store %arg7[%c20_165, %c0_166], %98 {strides = array<i32>} : memref<108x20xf32, #tpu.memory_space<vmem>>, vector<16x20xf32>,
    %c0_167 = arith.constant 0 : index
    %c5_168 = arith.constant 5 : index
    %c8_169 = arith.constant 8 : index
    %c0_170 = arith.constant 0 : index
    %100 = vector.load %arg2[%c0_167, %c5_168, %c8_169, %c0_170] : memref<1x8x16x30xf32, #tpu.memory_space<vmem>>, vector<1x1x4x20xf32>
    %101 = vector.shape_cast %100 : vector<1x1x4x20xf32> to vector<4x20xf32>
    %c36_171 = arith.constant 36 : index
    %c0_172 = arith.constant 0 : index
    %102 = vector.load %arg7[%c36_171, %c0_172] : memref<108x20xf32, #tpu.memory_space<vmem>>, vector<4x20xf32>
    tpu.vector_store %arg7[%c36_171, %c0_172], %101 {strides = array<i32>} : memref<108x20xf32, #tpu.memory_space<vmem>>, vector<4x20xf32>,
    %c0_173 = arith.constant 0 : index
    %c5_174 = arith.constant 5 : index
    %c4_175 = arith.constant 4 : index
    %c1_176 = arith.constant 1 : index
    %103 = vector.load %arg2[%c0_173, %c5_174, %c4_175, %c1_176] : memref<1x8x16x30xf32, #tpu.memory_space<vmem>>, vector<1x1x8x20xf32>
    %104 = vector.shape_cast %103 : vector<1x1x8x20xf32> to vector<8x20xf32>
    %c40_177 = arith.constant 40 : index
    %c0_178 = arith.constant 0 : index
    %105 = vector.load %arg7[%c40_177, %c0_178] : memref<108x20xf32, #tpu.memory_space<vmem>>, vector<8x20xf32>
    tpu.vector_store %arg7[%c40_177, %c0_178], %104 {strides = array<i32>} : memref<108x20xf32, #tpu.memory_space<vmem>>, vector<8x20xf32>,
    %c0_179 = arith.constant 0 : index
    %c5_180 = arith.constant 5 : index
    %c8_181 = arith.constant 8 : index
    %c5_182 = arith.constant 5 : index
    %106 = vector.load %arg2[%c0_179, %c5_180, %c8_181, %c5_182] : memref<1x8x16x30xf32, #tpu.memory_space<vmem>>, vector<1x1x8x20xf32>
    %107 = vector.shape_cast %106 : vector<1x1x8x20xf32> to vector<8x20xf32>
    %c48_183 = arith.constant 48 : index
    %c0_184 = arith.constant 0 : index
    %108 = vector.load %arg7[%c48_183, %c0_184] : memref<108x20xf32, #tpu.memory_space<vmem>>, vector<8x20xf32>
    tpu.vector_store %arg7[%c48_183, %c0_184], %107 {strides = array<i32>} : memref<108x20xf32, #tpu.memory_space<vmem>>, vector<8x20xf32>,
    %c0_185 = arith.constant 0 : index
    %c5_186 = arith.constant 5 : index
    %c0_187 = arith.constant 0 : index
    %c6_188 = arith.constant 6 : index
    %109 = vector.load %arg2[%c0_185, %c5_186, %c0_187, %c6_188] : memref<1x8x16x30xf32, #tpu.memory_space<vmem>>, vector<1x1x16x20xf32>
    %110 = vector.shape_cast %109 : vector<1x1x16x20xf32> to vector<16x20xf32>
    %c56_189 = arith.constant 56 : index
    %c0_190 = arith.constant 0 : index
    %111 = vector.load %arg7[%c56_189, %c0_190] : memref<108x20xf32, #tpu.memory_space<vmem>>, vector<16x20xf32>
    tpu.vector_store %arg7[%c56_189, %c0_190], %110 {strides = array<i32>} : memref<108x20xf32, #tpu.memory_space<vmem>>, vector<16x20xf32>,
    %c0_191 = arith.constant 0 : index
    %c6_192 = arith.constant 6 : index
    %c8_193 = arith.constant 8 : index
    %c0_194 = arith.constant 0 : index
    %112 = vector.load %arg2[%c0_191, %c6_192, %c8_193, %c0_194] : memref<1x8x16x30xf32, #tpu.memory_space<vmem>>, vector<1x1x4x20xf32>
    %113 = vector.shape_cast %112 : vector<1x1x4x20xf32> to vector<4x20xf32>
    %c72_195 = arith.constant 72 : index
    %c0_196 = arith.constant 0 : index
    %114 = vector.load %arg7[%c72_195, %c0_196] : memref<108x20xf32, #tpu.memory_space<vmem>>, vector<4x20xf32>
    tpu.vector_store %arg7[%c72_195, %c0_196], %113 {strides = array<i32>} : memref<108x20xf32, #tpu.memory_space<vmem>>, vector<4x20xf32>,
    %c0_197 = arith.constant 0 : index
    %c6_198 = arith.constant 6 : index
    %c4_199 = arith.constant 4 : index
    %c1_200 = arith.constant 1 : index
    %115 = vector.load %arg2[%c0_197, %c6_198, %c4_199, %c1_200] : memref<1x8x16x30xf32, #tpu.memory_space<vmem>>, vector<1x1x8x20xf32>
    %116 = vector.shape_cast %115 : vector<1x1x8x20xf32> to vector<8x20xf32>
    %c76_201 = arith.constant 76 : index
    %c0_202 = arith.constant 0 : index
    %117 = vector.load %arg7[%c76_201, %c0_202] : memref<108x20xf32, #tpu.memory_space<vmem>>, vector<8x20xf32>
    tpu.vector_store %arg7[%c76_201, %c0_202], %116 {strides = array<i32>} : memref<108x20xf32, #tpu.memory_space<vmem>>, vector<8x20xf32>,
    %c0_203 = arith.constant 0 : index
    %c6_204 = arith.constant 6 : index
    %c8_205 = arith.constant 8 : index
    %c5_206 = arith.constant 5 : index
    %118 = vector.load %arg2[%c0_203, %c6_204, %c8_205, %c5_206] : memref<1x8x16x30xf32, #tpu.memory_space<vmem>>, vector<1x1x8x20xf32>
    %119 = vector.shape_cast %118 : vector<1x1x8x20xf32> to vector<8x20xf32>
    %c84_207 = arith.constant 84 : index
    %c0_208 = arith.constant 0 : index
    %120 = vector.load %arg7[%c84_207, %c0_208] : memref<108x20xf32, #tpu.memory_space<vmem>>, vector<8x20xf32>
    tpu.vector_store %arg7[%c84_207, %c0_208], %119 {strides = array<i32>} : memref<108x20xf32, #tpu.memory_space<vmem>>, vector<8x20xf32>,
    %c0_209 = arith.constant 0 : index
    %c6_210 = arith.constant 6 : index
    %c0_211 = arith.constant 0 : index
    %c6_212 = arith.constant 6 : index
    %121 = vector.load %arg2[%c0_209, %c6_210, %c0_211, %c6_212] : memref<1x8x16x30xf32, #tpu.memory_space<vmem>>, vector<1x1x16x20xf32>
    %122 = vector.shape_cast %121 : vector<1x1x16x20xf32> to vector<16x20xf32>
    %c92_213 = arith.constant 92 : index
    %c0_214 = arith.constant 0 : index
    %123 = vector.load %arg7[%c92_213, %c0_214] : memref<108x20xf32, #tpu.memory_space<vmem>>, vector<16x20xf32>
    tpu.vector_store %arg7[%c92_213, %c0_214], %122 {strides = array<i32>} : memref<108x20xf32, #tpu.memory_space<vmem>>, vector<16x20xf32>,
    %c0_215 = arith.constant 0 : index
    %c0_216 = arith.constant 0 : index
    %124 = vector.load %arg7[%c0_215, %c0_216] : memref<108x20xf32, #tpu.memory_space<vmem>>, vector<108x20xf32>
    %cst_217 = arith.constant dense<0.000000e+00> : vector<8x20xf32>
    %125 = tpu.matmul %0, %124, %cst_217 {dimension_numbers = #tpu.dot_dimension_numbers<[1], [0], [0], [1], [0, 0, 1, 1], [], []>} : vector<8x108xf32>, vector<108x20xf32>, vector<8x20xf32> -> vector<8x20xf32>
    %126 = vector.broadcast %1 : vector<8x1xf32> to vector<8x20xf32>
    %127 = arith.addf %125, %126 : vector<8x20xf32>
    %c0_218 = arith.constant 0 : index
    %c2_219 = arith.constant 2 : index
    %c0_220 = arith.constant 0 : index
    %c0_221 = arith.constant 0 : index
    %128 = vector.load %arg6[%c0_218, %c2_219, %c0_220, %c0_221] : memref<1x4x8x20xf32, #tpu.memory_space<vmem>>, vector<1x1x8x20xf32>
    %129 = vector.shape_cast %128 : vector<1x1x8x20xf32> to vector<8x20xf32>
    %130 = vector.shape_cast %127 : vector<8x20xf32> to vector<1x1x8x20xf32>
    tpu.vector_store %arg6[%c0_218, %c2_219, %c0_220, %c0_221], %130 {strides = array<i32>} : memref<1x4x8x20xf32, #tpu.memory_space<vmem>>, vector<1x1x8x20xf32>,
    %c0_222 = arith.constant 0 : index
    %c6_223 = arith.constant 6 : index
    %c8_224 = arith.constant 8 : index
    %c0_225 = arith.constant 0 : index
    %131 = vector.load %arg2[%c0_222, %c6_223, %c8_224, %c0_225] : memref<1x8x16x30xf32, #tpu.memory_space<vmem>>, vector<1x1x4x20xf32>
    %132 = vector.shape_cast %131 : vector<1x1x4x20xf32> to vector<4x20xf32>
    %c0_226 = arith.constant 0 : index
    %c0_227 = arith.constant 0 : index
    %133 = vector.load %arg7[%c0_226, %c0_227] : memref<108x20xf32, #tpu.memory_space<vmem>>, vector<4x20xf32>
    tpu.vector_store %arg7[%c0_226, %c0_227], %132 {strides = array<i32>} : memref<108x20xf32, #tpu.memory_space<vmem>>, vector<4x20xf32>,
    %c0_228 = arith.constant 0 : index
    %c6_229 = arith.constant 6 : index
    %c4_230 = arith.constant 4 : index
    %c1_231 = arith.constant 1 : index
    %134 = vector.load %arg2[%c0_228, %c6_229, %c4_230, %c1_231] : memref<1x8x16x30xf32, #tpu.memory_space<vmem>>, vector<1x1x8x20xf32>
    %135 = vector.shape_cast %134 : vector<1x1x8x20xf32> to vector<8x20xf32>
    %c4_232 = arith.constant 4 : index
    %c0_233 = arith.constant 0 : index
    %136 = vector.load %arg7[%c4_232, %c0_233] : memref<108x20xf32, #tpu.memory_space<vmem>>, vector<8x20xf32>
    tpu.vector_store %arg7[%c4_232, %c0_233], %135 {strides = array<i32>} : memref<108x20xf32, #tpu.memory_space<vmem>>, vector<8x20xf32>,
    %c0_234 = arith.constant 0 : index
    %c6_235 = arith.constant 6 : index
    %c8_236 = arith.constant 8 : index
    %c5_237 = arith.constant 5 : index
    %137 = vector.load %arg2[%c0_234, %c6_235, %c8_236, %c5_237] : memref<1x8x16x30xf32, #tpu.memory_space<vmem>>, vector<1x1x8x20xf32>
    %138 = vector.shape_cast %137 : vector<1x1x8x20xf32> to vector<8x20xf32>
    %c12_238 = arith.constant 12 : index
    %c0_239 = arith.constant 0 : index
    %139 = vector.load %arg7[%c12_238, %c0_239] : memref<108x20xf32, #tpu.memory_space<vmem>>, vector<8x20xf32>
    tpu.vector_store %arg7[%c12_238, %c0_239], %138 {strides = array<i32>} : memref<108x20xf32, #tpu.memory_space<vmem>>, vector<8x20xf32>,
    %c0_240 = arith.constant 0 : index
    %c6_241 = arith.constant 6 : index
    %c0_242 = arith.constant 0 : index
    %c6_243 = arith.constant 6 : index
    %140 = vector.load %arg2[%c0_240, %c6_241, %c0_242, %c6_243] : memref<1x8x16x30xf32, #tpu.memory_space<vmem>>, vector<1x1x16x20xf32>
    %141 = vector.shape_cast %140 : vector<1x1x16x20xf32> to vector<16x20xf32>
    %c20_244 = arith.constant 20 : index
    %c0_245 = arith.constant 0 : index
    %142 = vector.load %arg7[%c20_244, %c0_245] : memref<108x20xf32, #tpu.memory_space<vmem>>, vector<16x20xf32>
    tpu.vector_store %arg7[%c20_244, %c0_245], %141 {strides = array<i32>} : memref<108x20xf32, #tpu.memory_space<vmem>>, vector<16x20xf32>,
    %c0_246 = arith.constant 0 : index
    %c7 = arith.constant 7 : index
    %c8_247 = arith.constant 8 : index
    %c0_248 = arith.constant 0 : index
    %143 = vector.load %arg2[%c0_246, %c7, %c8_247, %c0_248] : memref<1x8x16x30xf32, #tpu.memory_space<vmem>>, vector<1x1x4x20xf32>
    %144 = vector.shape_cast %143 : vector<1x1x4x20xf32> to vector<4x20xf32>
    %c36_249 = arith.constant 36 : index
    %c0_250 = arith.constant 0 : index
    %145 = vector.load %arg7[%c36_249, %c0_250] : memref<108x20xf32, #tpu.memory_space<vmem>>, vector<4x20xf32>
    tpu.vector_store %arg7[%c36_249, %c0_250], %144 {strides = array<i32>} : memref<108x20xf32, #tpu.memory_space<vmem>>, vector<4x20xf32>,
    %c0_251 = arith.constant 0 : index
    %c7_252 = arith.constant 7 : index
    %c4_253 = arith.constant 4 : index
    %c1_254 = arith.constant 1 : index
    %146 = vector.load %arg2[%c0_251, %c7_252, %c4_253, %c1_254] : memref<1x8x16x30xf32, #tpu.memory_space<vmem>>, vector<1x1x8x20xf32>
    %147 = vector.shape_cast %146 : vector<1x1x8x20xf32> to vector<8x20xf32>
    %c40_255 = arith.constant 40 : index
    %c0_256 = arith.constant 0 : index
    %148 = vector.load %arg7[%c40_255, %c0_256] : memref<108x20xf32, #tpu.memory_space<vmem>>, vector<8x20xf32>
    tpu.vector_store %arg7[%c40_255, %c0_256], %147 {strides = array<i32>} : memref<108x20xf32, #tpu.memory_space<vmem>>, vector<8x20xf32>,
    %c0_257 = arith.constant 0 : index
    %c7_258 = arith.constant 7 : index
    %c8_259 = arith.constant 8 : index
    %c5_260 = arith.constant 5 : index
    %149 = vector.load %arg2[%c0_257, %c7_258, %c8_259, %c5_260] : memref<1x8x16x30xf32, #tpu.memory_space<vmem>>, vector<1x1x8x20xf32>
    %150 = vector.shape_cast %149 : vector<1x1x8x20xf32> to vector<8x20xf32>
    %c48_261 = arith.constant 48 : index
    %c0_262 = arith.constant 0 : index
    %151 = vector.load %arg7[%c48_261, %c0_262] : memref<108x20xf32, #tpu.memory_space<vmem>>, vector<8x20xf32>
    tpu.vector_store %arg7[%c48_261, %c0_262], %150 {strides = array<i32>} : memref<108x20xf32, #tpu.memory_space<vmem>>, vector<8x20xf32>,
    %c0_263 = arith.constant 0 : index
    %c7_264 = arith.constant 7 : index
    %c0_265 = arith.constant 0 : index
    %c6_266 = arith.constant 6 : index
    %152 = vector.load %arg2[%c0_263, %c7_264, %c0_265, %c6_266] : memref<1x8x16x30xf32, #tpu.memory_space<vmem>>, vector<1x1x16x20xf32>
    %153 = vector.shape_cast %152 : vector<1x1x16x20xf32> to vector<16x20xf32>
    %c56_267 = arith.constant 56 : index
    %c0_268 = arith.constant 0 : index
    %154 = vector.load %arg7[%c56_267, %c0_268] : memref<108x20xf32, #tpu.memory_space<vmem>>, vector<16x20xf32>
    tpu.vector_store %arg7[%c56_267, %c0_268], %153 {strides = array<i32>} : memref<108x20xf32, #tpu.memory_space<vmem>>, vector<16x20xf32>,
    %c0_269 = arith.constant 0 : index
    %c0_270 = arith.constant 0 : index
    %c8_271 = arith.constant 8 : index
    %c0_272 = arith.constant 0 : index
    %155 = vector.load %arg3[%c0_269, %c0_270, %c8_271, %c0_272] : memref<1x1x16x30xf32, #tpu.memory_space<vmem>>, vector<1x1x4x20xf32>
    %156 = vector.shape_cast %155 : vector<1x1x4x20xf32> to vector<4x20xf32>
    %c72_273 = arith.constant 72 : index
    %c0_274 = arith.constant 0 : index
    %157 = vector.load %arg7[%c72_273, %c0_274] : memref<108x20xf32, #tpu.memory_space<vmem>>, vector<4x20xf32>
    tpu.vector_store %arg7[%c72_273, %c0_274], %156 {strides = array<i32>} : memref<108x20xf32, #tpu.memory_space<vmem>>, vector<4x20xf32>,
    %c0_275 = arith.constant 0 : index
    %c0_276 = arith.constant 0 : index
    %c4_277 = arith.constant 4 : index
    %c1_278 = arith.constant 1 : index
    %158 = vector.load %arg3[%c0_275, %c0_276, %c4_277, %c1_278] : memref<1x1x16x30xf32, #tpu.memory_space<vmem>>, vector<1x1x8x20xf32>
    %159 = vector.shape_cast %158 : vector<1x1x8x20xf32> to vector<8x20xf32>
    %c76_279 = arith.constant 76 : index
    %c0_280 = arith.constant 0 : index
    %160 = vector.load %arg7[%c76_279, %c0_280] : memref<108x20xf32, #tpu.memory_space<vmem>>, vector<8x20xf32>
    tpu.vector_store %arg7[%c76_279, %c0_280], %159 {strides = array<i32>} : memref<108x20xf32, #tpu.memory_space<vmem>>, vector<8x20xf32>,
    %c0_281 = arith.constant 0 : index
    %c0_282 = arith.constant 0 : index
    %c8_283 = arith.constant 8 : index
    %c5_284 = arith.constant 5 : index
    %161 = vector.load %arg3[%c0_281, %c0_282, %c8_283, %c5_284] : memref<1x1x16x30xf32, #tpu.memory_space<vmem>>, vector<1x1x8x20xf32>
    %162 = vector.shape_cast %161 : vector<1x1x8x20xf32> to vector<8x20xf32>
    %c84_285 = arith.constant 84 : index
    %c0_286 = arith.constant 0 : index
    %163 = vector.load %arg7[%c84_285, %c0_286] : memref<108x20xf32, #tpu.memory_space<vmem>>, vector<8x20xf32>
    tpu.vector_store %arg7[%c84_285, %c0_286], %162 {strides = array<i32>} : memref<108x20xf32, #tpu.memory_space<vmem>>, vector<8x20xf32>,
    %c0_287 = arith.constant 0 : index
    %c0_288 = arith.constant 0 : index
    %c0_289 = arith.constant 0 : index
    %c6_290 = arith.constant 6 : index
    %164 = vector.load %arg3[%c0_287, %c0_288, %c0_289, %c6_290] : memref<1x1x16x30xf32, #tpu.memory_space<vmem>>, vector<1x1x16x20xf32>
    %165 = vector.shape_cast %164 : vector<1x1x16x20xf32> to vector<16x20xf32>
    %c92_291 = arith.constant 92 : index
    %c0_292 = arith.constant 0 : index
    %166 = vector.load %arg7[%c92_291, %c0_292] : memref<108x20xf32, #tpu.memory_space<vmem>>, vector<16x20xf32>
    tpu.vector_store %arg7[%c92_291, %c0_292], %165 {strides = array<i32>} : memref<108x20xf32, #tpu.memory_space<vmem>>, vector<16x20xf32>,
    %c0_293 = arith.constant 0 : index
    %c0_294 = arith.constant 0 : index
    %167 = vector.load %arg7[%c0_293, %c0_294] : memref<108x20xf32, #tpu.memory_space<vmem>>, vector<108x20xf32>
    %cst_295 = arith.constant dense<0.000000e+00> : vector<8x20xf32>
    %168 = tpu.matmul %0, %167, %cst_295 {dimension_numbers = #tpu.dot_dimension_numbers<[1], [0], [0], [1], [0, 0, 1, 1], [], []>} : vector<8x108xf32>, vector<108x20xf32>, vector<8x20xf32> -> vector<8x20xf32>
    %169 = vector.broadcast %1 : vector<8x1xf32> to vector<8x20xf32>
    %170 = arith.addf %168, %169 : vector<8x20xf32>
    %c0_296 = arith.constant 0 : index
    %c3_297 = arith.constant 3 : index
    %c0_298 = arith.constant 0 : index
    %c0_299 = arith.constant 0 : index
    %171 = vector.load %arg6[%c0_296, %c3_297, %c0_298, %c0_299] : memref<1x4x8x20xf32, #tpu.memory_space<vmem>>, vector<1x1x8x20xf32>
    %172 = vector.shape_cast %171 : vector<1x1x8x20xf32> to vector<8x20xf32>
    %173 = vector.shape_cast %170 : vector<8x20xf32> to vector<1x1x8x20xf32>
    tpu.vector_store %arg6[%c0_296, %c3_297, %c0_298, %c0_299], %173 {strides = array<i32>} : memref<1x4x8x20xf32, #tpu.memory_space<vmem>>, vector<1x1x8x20xf32>,
    return
  }
  func.func @transform_0(%arg0: i32, %arg1: i32) -> (i32, i32, i32, i32) {
    %c0_i32 = arith.constant 0 : i32
    %c0_i32_0 = arith.constant 0 : i32
    %c0_i32_1 = arith.constant 0 : i32
    return %arg0, %arg1, %c0_i32, %c0_i32_0 : i32, i32, i32, i32
  }
  func.func @transform_1(%arg0: i32, %arg1: i32) -> (i32, i32, i32, i32) {
    %c1_i32 = arith.constant 1 : i32
    %0 = arith.addi %arg1, %c1_i32 : i32
    %c8_i32 = arith.constant 8 : i32
    %1 = arith.muli %c8_i32, %0 : i32
    %c0_i32 = arith.constant 0 : i32
    %c0_i32_0 = arith.constant 0 : i32
    %c0_i32_1 = arith.constant 0 : i32
    return %arg0, %1, %c0_i32, %c0_i32_0 : i32, i32, i32, i32
  }
  func.func @transform_2(%arg0: i32, %arg1: i32) -> (i32, i32) {
    %c0_i32 = arith.constant 0 : i32
    %c0_i32_0 = arith.constant 0 : i32
    %c0_i32_1 = arith.constant 0 : i32
    return %c0_i32, %c0_i32_0 : i32, i32
  }
  func.func @transform_3(%arg0: i32, %arg1: i32) -> (i32, i32) {
    %c0_i32 = arith.constant 0 : i32
    %c0_i32_0 = arith.constant 0 : i32
    %c0_i32_1 = arith.constant 0 : i32
    return %c0_i32, %c0_i32_0 : i32, i32
  }
  func.func @transform_4(%arg0: i32, %arg1: i32) -> (i32, i32, i32, i32) {
    %c0_i32 = arith.constant 0 : i32
    %c0_i32_0 = arith.constant 0 : i32
    %c0_i32_1 = arith.constant 0 : i32
    return %arg0, %arg1, %c0_i32, %c0_i32_0 : i32, i32, i32, i32
  }
}

</mosaic_0001>

<bundles_post_ra>
// kernel: endown_forward.1
= control target key start
LH: loop header
LB: loop body
LE: loop exit
PB: predicated region body
PF: predicated region fallthrough
CT: control target
= control target key end

     0   :  { %s1552_s15 = smov 0   ;;  %s1554_s16 = smov 0   ;;  %s1815_s0 = inlined_call_operand.vmem [shape: f32[2,9,16,30], index: 0, kind: input, shape index: {}, may-alias: {0,1}]   ;;  %s1816_s1 = inlined_call_operand.vmem [shape: f32[2,9,16,30], index: 1, kind: input, shape index: {}, may-alias: {0,1}]   ;;  %s1817_s2 = inlined_call_operand.vmem [shape: f32[8,108], index: 2, kind: input, shape index: {}]   ;;  %s1818_s3 = inlined_call_operand.vmem [shape: f32[8,1], index: 3, kind: input, shape index: {}]   ;;  %s1819_s4 = inlined_call_operand.vmem [shape: f32[2,4,8,20], index: 4, kind: output, shape index: {}]  }
   0x1   :  { %s1556_s17 = smov 0  }
   0x2 LB: > { %s26_s18 = sadd.s32 1, %s1513_s16  ;;  %p1116_p0 = scmp.ge.s32.totalorder %s1517_s17, 1  ;;  %s1517_s17 = sphi %s1556_s17, %s14_s17   ;;  %s1513_s16 = sphi %s1554_s16, %s1823_s16   ;;  %s1509_s15 = sphi %s1552_s15, %s1822_s15  }
   0x3   : > { %p28_p1 = scmp.ge.s32.totalorder %s26_s18, 2  ;;  %p218_p2 = scmp.lt.s32.totalorder %s1517_s17, 3 }
   0x5   : > { %s1825_s18 = smov (%p28_p1, %s26_s18), 0  ;;  %p219_p3 = pnand %p1116_p0, %p218_p2 }
   0x6   : > { %p275_p4 = scmp.lt.s32.totalorder (!%p219_p3), %s1509_s15, 1  ;;  %s1519_s23 = smov (!%p219_p3), 122   ;;  %v1521_v3 = vmov (!%p219_p3), 0.0|0.0   ;;  %vm316_vm0 = vcmask (!%p219_p3), 158720   ;;  %vm1523_vm1 = vmmov (!%p219_p3), 0   ;;  %v1524_v19 = vmov (!%p219_p3), 0.0  }
   0x7   : > { %222 = sbr.rel (%p219_p3) target bundleno = 459 (0x1cb), region = 36  ;;  %s1520_s24 = smov (!%p219_p3), 127   ;;  %1371 = vmatprep.subr.bf16.mxu0 (!%p219_p3), %v1521_v3  ;;  %1393 = vmatprep.subr.bf16.mxu1 (!%p219_p3), %v1521_v3  ;;  %v314_v32 = vld [vmem:[%s1818_s3] sm:$0xff] (!%p219_p3)  ;;  %v1525_v33 = vmov (!%p219_p3), 0   ;;  %vm323_vm2 = vcmask (!%p219_p3), 162816   ;;  %vm420_vm3 = vcmask (!%p219_p3), 1043456  }
   0x8   : > { %s1522_s25 = smov (!%p219_p3), 123   ;;  %1275 = vmatprep.mubr.msk.f32.mxu0 (!%p219_p3), %vm1523_vm1, %v1524_v19  ;;  %1306 = vmatprep.mubr.msk.f32.mxu1 (!%p219_p3), %vm1523_vm1, %v1524_v19  ;;  %vm1526_vm4 = vmmov (!%p219_p3), 1   ;;  %vm416_vm6 = vcmask (!%p219_p3), 883712  }
   0x9   : > { %1494 = vset.pattern.permute.xlu0 (!%p219_p3), %v1525_v33  ;;  %vm1715_vm5 = vmpackc.low (!%p219_p3), %vm420_vm3, %vm1526_vm4 }
   0xe   : > { %s1827_s15 = smov (!%p275_p4, %s1509_s15), 1 }
   0xf   : > { %s1459_s19 = smul.u32 144, %s1827_s15  ;;  %s1186_s8 = sshll.u32 %s1827_s15, 5 }
  0x10   : > { %s311_s11 = scalar_lea.vmem %s1819_s4, %s1186_s8 }
  0x11   : > { %s1578_s22 = scalar_lea.vmem %s1815_s0, %s1459_s19  ;;  %s1185_s26 = sadd.s32 128, %s1459_s19 }
  0x12   : > { %v331_v0 = vld [vmem:[%s1578_s22] sm:$0xff]  ;;  %v332_v2 = vld [vmem:[%s1578_s22 + $0x8] sm:$0xff]  ;;  %v1122_v5 = vld [vmem:[%s1578_s22 + $0x14] sm:$0xff]  ;;  %s1663_s29 = scalar_lea.vmem %s1816_s1, %s1185_s26 }
  0x13   : > { %v318_v1 = vld [vmem:[%s1578_s22 + $0x4] sm:$0xff]  ;;  %335 = vrot.lane.b32.xlu1 %v331_v0, %s1519_s23  ;;  %v1123_v6 = vld [vmem:[%s1578_s22 + $0x18] sm:$0xff]  ;;  %v1124_v12 = vld [vmem:[%s1578_s22 + $0x10] sm:$0xff] }
  0x14   : > { %320 = vrot.lane.b32.xlu0 %v318_v1, %s1520_s24  ;;  %v1134_v4 = vld [vmem:[%s1578_s22 + $0x24] sm:$0xff]  ;;  %v1121_v9 = vld [vmem:[%s1578_s22 + $0x18] sm:$0xf]  ;;  %v1141_v15 = vld [vmem:[%s1578_s22 + $0x30] sm:$0xff] }
  0x15   : > { %v1135_v7 = vld [vmem:[%s1578_s22 + $0x28] sm:$0xff]  ;;  %345 = vst.msk [vmem:[#allocation2 + $0x24] sm:$0xf] %vm316_vm0, %v1121_v9  ;;  %v1136_v11 = vld [vmem:[%s1578_s22 + $0x20] sm:$0xff]  ;;  %v1139_v13 = vld [vmem:[%s1578_s22 + $0x34] sm:$0xff] }
  0x16   : > { %v315_v8 = vld [vmem:[%s1578_s22 + $0x8] sm:$0xf]  ;;  %v1140_v14 = vld [vmem:[%s1578_s22 + $0x38] sm:$0xff]  ;;  %v1146_v18 = vld [vmem:[%s1578_s22 + $0x40] sm:$0xff] }
  0x17   : > { %337 = vrot.lane.b32.xlu1 %v332_v2, %s1519_s23  ;;  %317 = vst.msk [vmem:[#allocation2] sm:$0xf] %vm316_vm0, %v315_v8  ;;  %v1126_v10 = vld [vmem:[%s1578_s22 + $0x28] sm:$0xf]  ;;  %v1157_v21 = vld [vmem:[%s1578_s22 + $0x54] sm:$0xff]  ;;  %v1172_v24 = vld [vmem:[%s1578_s22 + $0x60] sm:$0xff] }
  0x18   : > { %327 = vrot.lane.b32.xlu0 %v332_v2, %s1522_s25  ;;  %372 = vst.msk [vmem:[#allocation2 + $0x48] sm:$0xf] %vm316_vm0, %v1126_v10  ;;  %v1145_v16 = vld [vmem:[%s1578_s22 + $0x48] sm:$0xff]  ;;  %v1158_v22 = vld [vmem:[%s1578_s22 + $0x58] sm:$0xff]  ;;  %v1159_v25 = vld [vmem:[%s1578_s22 + $0x50] sm:$0xff] }
  0x19   : > { %v1144_v17 = vld [vmem:[%s1578_s22 + $0x44] sm:$0xff]  ;;  %v1175_v26 = vld [vmem:[%s1578_s22 + $0x74] sm:$0xff] }
  0x1a   : > { %v1170_v20 = vld [vmem:[%s1578_s22 + $0x64] sm:$0xff]  ;;  %v1176_v27 = vld [vmem:[%s1578_s22 + $0x78] sm:$0xff]  ;;  %v1177_v28 = vld [vmem:[%s1578_s22 + $0x70] sm:$0xff] }
  0x1b   : > { %499 = vrot.lane.b32.xlu1 %v1134_v4, %s1520_s24  ;;  %v1171_v23 = vld [vmem:[%s1578_s22 + $0x68] sm:$0xff]  ;;  %v900_v31 = vld [vmem:[%s1663_s29] sm:$0xff]  ;;  %v1138_v42 = vld [vmem:[%s1578_s22 + $0x38] sm:$0xf] }
  0x1c   : > { %348 = vrot.lane.b32.xlu0 %v1122_v5, %s1520_s24  ;;  %v894_v29 = vld [vmem:[%s1663_s29 + $0x8] sm:$0xff]  ;;  %v1156_v2 = vld [vmem:[%s1578_s22 + $0x58] sm:$0xf] }
  0x1d   : > { %v888_v30 = vld [vmem:[%s1663_s29 + $0x4] sm:$0xff] }
  0x1e   : > { %v1133_v38 = vld [vmem:[%s1578_s22 + $0x28] sm:$0xf] }
  0x1f   : > { %354 = vrot.lane.b32.xlu1 %v1123_v6, %s1522_s25  ;;  %v1151_v54 = vld [vmem:[%s1578_s22 + $0x48] sm:$0xf] }
  0x20   : > { %505 = vrot.lane.b32.xlu0 %v1135_v7, %s1522_s25 }
  0x23   : > { %513 = vrot.lane.b32.xlu1 %v1136_v11, %s1519_s23 }
  0x24   : > { %362 = vrot.lane.b32.xlu0 %v1124_v12, %s1519_s23 }
  0x27   : > { %364 = vrot.lane.b32.xlu1 %v1123_v6, %s1519_s23 }
  0x28   : > { %515 = vrot.lane.b32.xlu0 %v1135_v7, %s1519_s23 }
  0x2b   : > { %381 = vrot.lane.b32.xlu1 %v1135_v7, %s1522_s25 }
  0x2c   : > { %375 = vrot.lane.b32.xlu0 %v1134_v4, %s1520_s24 }
  0x2f   : > { %389 = vrot.lane.b32.xlu1 %v1136_v11, %s1519_s23  ;;  %v1143_v11 = vld [vmem:[%s1578_s22 + $0x48] sm:$0xf] }
  0x30   : > { %526 = vrot.lane.b32.xlu0 %v1139_v13, %s1520_s24 }
  0x33   : > { %532 = vrot.lane.b32.xlu1 %v1140_v14, %s1522_s25 }
  0x34   : > { %391 = vrot.lane.b32.xlu0 %v1135_v7, %s1519_s23 }
  0x37   : > { %542 = vrot.lane.b32.xlu1 %v1140_v14, %s1519_s23 }
  0x38   : > { %540 = vrot.lane.b32.xlu0 %v1141_v15, %s1519_s23 }
  0x3b   : > { %559 = vrot.lane.b32.xlu1 %v1145_v16, %s1522_s25 }
  0x3c   : > { %553 = vrot.lane.b32.xlu0 %v1144_v17, %s1520_s24 }
  0x3f   : > { %668 = vrot.lane.b32.xlu1 %v1144_v17, %s1520_s24 }
  0x40   : > { %567 = vrot.lane.b32.xlu0 %v1146_v18, %s1519_s23 }
  0x43   : > { %682 = vrot.lane.b32.xlu1 %v1146_v18, %s1519_s23 }
  0x44   : > { %674 = vrot.lane.b32.xlu0 %v1145_v16, %s1522_s25 }
  0x47   : > { %684 = vrot.lane.b32.xlu1 %v1145_v16, %s1519_s23 }
  0x48   : > { %569 = vrot.lane.b32.xlu0 %v1145_v16, %s1519_s23 }
  0x4b   : > { %837 = vrot.lane.b32.xlu1 %v1170_v20, %s1520_s24 }
  0x4c   : > { %695 = vrot.lane.b32.xlu0 %v1157_v21, %s1520_s24 }
  0x4f   : > { %701 = vrot.lane.b32.xlu1 %v1158_v22, %s1522_s25 }
  0x50   : > { %843 = vrot.lane.b32.xlu0 %v1171_v23, %s1522_s25 }
  0x53   : > { %851 = vrot.lane.b32.xlu1 %v1172_v24, %s1519_s23 }
  0x54   : > { %709 = vrot.lane.b32.xlu0 %v1159_v25, %s1519_s23 }
  0x57   : > { %711 = vrot.lane.b32.xlu1 %v1158_v22, %s1519_s23 }
  0x58   : > { %853 = vrot.lane.b32.xlu0 %v1171_v23, %s1519_s23 }
  0x5b   : > { %728 = vrot.lane.b32.xlu1 %v1171_v23, %s1522_s25 }
  0x5c   : > { %722 = vrot.lane.b32.xlu0 %v1170_v20, %s1520_s24 }
  0x5f   : > { %736 = vrot.lane.b32.xlu1 %v1172_v24, %s1519_s23 }
  0x60   : > { %864 = vrot.lane.b32.xlu0 %v1175_v26, %s1520_s24 }
  0x63   : > { %870 = vrot.lane.b32.xlu1 %v1176_v27, %s1522_s25 }
  0x64   : > { %738 = vrot.lane.b32.xlu0 %v1171_v23, %s1519_s23 }
  0x67   : > { %880 = vrot.lane.b32.xlu1 %v1176_v27, %s1519_s23 }
  0x68   : > { %878 = vrot.lane.b32.xlu0 %v1177_v28, %s1519_s23 }
  0x6b   : > { %896 = vrot.lane.b32.xlu1 %v894_v29, %s1522_s25 }
  0x6c   : > { %890 = vrot.lane.b32.xlu0 %v888_v30, %s1520_s24 }
  0x6f   : > { %906 = vrot.lane.b32.xlu1 %v894_v29, %s1519_s23 }
  0x70   : > { %904 = vrot.lane.b32.xlu0 %v900_v31, %s1519_s23  ;;  %v1727_v31 = vld [vmem:[%s1817_s2] sm:$0xff] }
  0x74   : > { %413 = vperm.xlu0 %1494, %v314_v32  }
  0x85   : > { %v336_v34 = vpop.permute.xlu1 %335 }
  0x86   : > { %v321_v35 = vpop.permute.xlu0 %320  ;;  %341 = vst.msk [vmem:[#allocation2 + $0x14] sm:$0xff] %vm323_vm2, %v336_v34 }
  0x87   : > { %324 = vst.msk [vmem:[#allocation2 + $0x4] sm:$0xff] %vm323_vm2, %v321_v35 }
  0x89   : > { %v338_v36 = vpop.permute.xlu1 %337 }
  0x8a   : > { %v328_v37 = vpop.permute.xlu0 %327  ;;  %342 = vst.msk [vmem:[#allocation2 + $0x1c] sm:$0xff] %vm323_vm2, %v338_v36 }
  0x8b   : > { %330 = vst.msk [vmem:[#allocation2 + $0xc] sm:$0xff] %vm323_vm2, %v328_v37  ;;  %v1161_v37 = vld [vmem:[%s1578_s22 + $0x68] sm:$0xf] }
  0x8d   : > { %v500_v39 = vpop.permute.xlu1 %499 }
  0x8e   : > { %v397_v40 = vld [vmem:[#allocation2] sm:$0xff]  ;;  %v349_v41 = vpop.permute.xlu0 %348 }
  0x8f   : > { %351 = vst.msk [vmem:[#allocation2 + $0x28] sm:$0xff] %vm323_vm2, %v349_v41 }
  0x90   : > { %496 = vst.msk [vmem:[#allocation2] sm:$0xf] %vm316_vm0, %v1133_v38 }
  0x91   : > { %v355_v44 = vpop.permute.xlu1 %354  ;;  %v401_v48 = vld [vmem:[#allocation2 + $0x20] sm:$0xff]  ;;  %v400_v49 = vld [vmem:[#allocation2 + $0x18] sm:$0xff] }
  0x92   : > { %v398_v43 = vld [vmem:[#allocation2 + $0x8] sm:$0xff]  ;;  %v399_v45 = vld [vmem:[#allocation2 + $0x10] sm:$0xff]  ;;  %v506_v46 = vpop.permute.xlu0 %505  ;;  %357 = vst.msk [vmem:[#allocation2 + $0x30] sm:$0xff] %vm323_vm2, %v355_v44 }
  0x93   : > { %502 = vst.msk [vmem:[#allocation2 + $0x4] sm:$0xff] %vm323_vm2, %v500_v39  ;;  %508 = vst.msk [vmem:[#allocation2 + $0xc] sm:$0xff] %vm323_vm2, %v506_v46  ;;  %v1372_v47 = vpack.c.bf16 %v398_v43, %v397_v40  ;;  %v1375_v52 = vpack.c.bf16 %v400_v49, %v399_v45 }
  0x94   : > { %523 = vst.msk [vmem:[#allocation2 + $0x24] sm:$0xf] %vm316_vm0, %v1138_v42  ;;  %v1169_v42 = vld [vmem:[%s1578_s22 + $0x68] sm:$0xf] }
  0x95   : > { %1373 = vmatpush3.bf16.msra.mxu0 %v1372_v47  ;;  %v514_v50 = vpop.permute.xlu1 %513 }
  0x96   : > { %v363_v51 = vpop.permute.xlu0 %362  ;;  %1374 = vmatprep.subr.bf16.mxu0 %v1521_v3  ;;  %519 = vst.msk [vmem:[#allocation2 + $0x14] sm:$0xff] %vm323_vm2, %v514_v50  ;;  %v402_v53 = vld [vmem:[#allocation2 + $0x28] sm:$0xff] }
  0x97   : > { %368 = vst.msk [vmem:[#allocation2 + $0x38] sm:$0xff] %vm323_vm2, %v363_v51  ;;  %v1378_v59 = vpack.c.bf16 %v402_v53, %v401_v48 }
  0x99   : > { %1376 = vmatpush3.bf16.msra.mxu0 %v1375_v52  ;;  %v365_v55 = vpop.permute.xlu1 %364  ;;  %v403_v61 = vld [vmem:[#allocation2 + $0x30] sm:$0xff] }
  0x9a   : > { %v516_v56 = vpop.permute.xlu0 %515  ;;  %1377 = vmatprep.subr.bf16.mxu0 %v1521_v3  ;;  %v575_v57 = vld [vmem:[#allocation2] sm:$0xff]  ;;  %v576_v58 = vld [vmem:[#allocation2 + $0x8] sm:$0xff]  ;;  %369 = vst.msk [vmem:[#allocation2 + $0x40] sm:$0xff] %vm323_vm2, %v365_v55 }
  0x9b   : > { %520 = vst.msk [vmem:[#allocation2 + $0x1c] sm:$0xff] %vm323_vm2, %v516_v56  ;;  %v1394_v60 = vpack.c.bf16 %v576_v58, %v575_v57 }
  0x9c   : > { %665 = vst.msk [vmem:[#allocation2] sm:$0xf] %vm316_vm0, %v1151_v54  ;;  %v1174_v54 = vld [vmem:[%s1578_s22 + $0x78] sm:$0xf] }
  0x9d   : > { %1379 = vmatpush3.bf16.msra.mxu0 %v1378_v59  ;;  %1395 = vmatpush3.bf16.msra.mxu1 %v1394_v60  ;;  %v382_v62 = vpop.permute.xlu1 %381  ;;  %v577_v6 = vld [vmem:[#allocation2 + $0x10] sm:$0xff] }
  0x9e   : > { %v376_v63 = vpop.permute.xlu0 %375  ;;  %1380 = vmatprep.subr.bf16.mxu0 %v1521_v3  ;;  %v404_v0 = vld [vmem:[#allocation2 + $0x38] sm:$0xff]  ;;  %1396 = vmatprep.subr.bf16.mxu1 %v1521_v3  ;;  %384 = vst.msk [vmem:[#allocation2 + $0x54] sm:$0xff] %vm323_vm2, %v382_v62 }
  0x9f   : > { %378 = vst.msk [vmem:[#allocation2 + $0x4c] sm:$0xff] %vm323_vm2, %v376_v63  ;;  %v1381_v1 = vpack.c.bf16 %v404_v0, %v403_v61 }
  0xa1   : > { %1382 = vmatpush3.bf16.msra.mxu0 %v1381_v1  ;;  %v390_v4 = vpop.permute.xlu1 %389  ;;  %v405_v10 = vld [vmem:[#allocation2 + $0x40] sm:$0xff] }
  0xa2   : > { %v527_v5 = vpop.permute.xlu0 %526  ;;  %v578_v7 = vld [vmem:[#allocation2 + $0x18] sm:$0xff]  ;;  %1383 = vmatprep.subr.bf16.mxu0 %v1521_v3  ;;  %v579_v8 = vld [vmem:[#allocation2 + $0x20] sm:$0xff]  ;;  %395 = vst.msk [vmem:[#allocation2 + $0x5c] sm:$0xff] %vm323_vm2, %v390_v4 }
  0xa3   : > { %529 = vst.msk [vmem:[#allocation2 + $0x28] sm:$0xff] %vm323_vm2, %v527_v5  ;;  %v1397_v9 = vpack.c.bf16 %v578_v7, %v577_v6 }
  0xa4   : > { %692 = vst.msk [vmem:[#allocation2 + $0x24] sm:$0xf] %vm316_vm0, %v1156_v2 }
  0xa5   : > { %1398 = vmatpush3.bf16.msra.mxu1 %v1397_v9  ;;  %v533_v12 = vpop.permute.xlu1 %532 }
  0xa6   : > { %v392_v13 = vpop.permute.xlu0 %391  ;;  %v406_v14 = vld [vmem:[#allocation2 + $0x48] sm:$0xff]  ;;  %1399 = vmatprep.subr.bf16.mxu1 %v1521_v3  ;;  %535 = vst.msk [vmem:[#allocation2 + $0x30] sm:$0xff] %vm323_vm2, %v533_v12  ;;  %v407_v18 = vld [vmem:[#allocation2 + $0x50] sm:$0xff] }
  0xa7   : > { %396 = vst.msk [vmem:[#allocation2 + $0x64] sm:$0xff] %vm323_vm2, %v392_v13  ;;  %v1384_v15 = vpack.c.bf16 %v406_v14, %v405_v10 }
  0xa8   : > { %550 = vst.msk [vmem:[#allocation2 + $0x48] sm:$0xf] %vm316_vm0, %v1143_v11 }
  0xa9   : > { %1385 = vmatpush3.bf16.msra.mxu0 %v1384_v15  ;;  %v543_v16 = vpop.permute.xlu1 %542  ;;  %v408_v20 = vld [vmem:[#allocation2 + $0x58] sm:$0xff] }
  0xaa   : > { %v541_v17 = vpop.permute.xlu0 %540  ;;  %1386 = vmatprep.subr.bf16.mxu0 %v1521_v3  ;;  %v580_v21 = vld [vmem:[#allocation2 + $0x28] sm:$0xff]  ;;  %547 = vst.msk [vmem:[#allocation2 + $0x40] sm:$0xff] %vm323_vm2, %v543_v16  ;;  %v1387_v22 = vpack.c.bf16 %v408_v20, %v407_v18 }
  0xab   : > { %546 = vst.msk [vmem:[#allocation2 + $0x38] sm:$0xff] %vm323_vm2, %v541_v17  ;;  %v1400_v23 = vpack.c.bf16 %v580_v21, %v579_v8  ;;  %v886_v18 = vld [vmem:[%s1663_s29 + $0x8] sm:$0xf] }
  0xad   : > { %1388 = vmatpush3.bf16.msra.mxu0 %v1387_v22  ;;  %1401 = vmatpush3.bf16.msra.mxu1 %v1400_v23  ;;  %v560_v24 = vpop.permute.xlu1 %559  ;;  %v581_v30 = vld [vmem:[#allocation2 + $0x30] sm:$0xff] }
  0xae   : > { %v554_v25 = vpop.permute.xlu0 %553  ;;  %1389 = vmatprep.subr.bf16.mxu0 %v1521_v3  ;;  %v409_v26 = vld [vmem:[#allocation2 + $0x60] sm:$0xff]  ;;  %v410_v27 = vld [vmem:[#allocation2 + $0x68] sm:$0xf]  ;;  %1402 = vmatprep.subr.bf16.mxu1 %v1521_v3  ;;  %562 = vst.msk [vmem:[#allocation2 + $0x54] sm:$0xff] %vm323_vm2, %v560_v24 }
  0xaf   : > { %556 = vst.msk [vmem:[#allocation2 + $0x4c] sm:$0xff] %vm323_vm2, %v554_v25  ;;  %v1390_v29 = vpack.c.bf16 %v410_v27, %v409_v26 }
  0xb1   : > { %1392 = vmatpush3.bf16.msk.msra.mxu0 %vm1715_vm5, %v1390_v29  ;;  %v669_v32 = vpop.permute.xlu1 %668  ;;  %v583_v36 = vld [vmem:[#allocation2 + $0x40] sm:$0xff] }
  0xb2   : > { %v568_v33 = vpop.permute.xlu0 %567  ;;  %v582_v34 = vld [vmem:[#allocation2 + $0x38] sm:$0xff]  ;;  %1415 = vmatprep.subr.bf16.mxu0 %v1521_v3  ;;  %671 = vst.msk [vmem:[#allocation2 + $0x4] sm:$0xff] %vm323_vm2, %v669_v32 }
  0xb3   : > { %573 = vst.msk [vmem:[#allocation2 + $0x5c] sm:$0xff] %vm323_vm2, %v568_v33  ;;  %v1403_v35 = vpack.c.bf16 %v582_v34, %v581_v30 }
  0xb4   : > { %1276 = vmatmul.mubr.msk.f32.vlgmr.msra.gmra.mrb[0].mxu0 %vm416_vm6, %v1727_v31 }
  0xb5   : > { %1404 = vmatpush3.bf16.msra.mxu1 %v1403_v35  ;;  %1337 = vmatprep.mubr.msk.f32.mxu0 %vm1523_vm1, %v1524_v19  ;;  %v683_v38 = vpop.permute.xlu1 %682 }
  0xb6   : > { %v675_v39 = vpop.permute.xlu0 %674  ;;  %1405 = vmatprep.subr.bf16.mxu1 %v1521_v3  ;;  %v584_v40 = vld [vmem:[#allocation2 + $0x48] sm:$0xff]  ;;  %688 = vst.msk [vmem:[#allocation2 + $0x14] sm:$0xff] %vm323_vm2, %v683_v38  ;;  %v585_v45 = vld [vmem:[#allocation2 + $0x50] sm:$0xff] }
  0xb7   : > { %677 = vst.msk [vmem:[#allocation2 + $0xc] sm:$0xff] %vm323_vm2, %v675_v39  ;;  %v1406_v41 = vpack.c.bf16 %v584_v40, %v583_v36 }
  0xb8   : > { %719 = vst.msk [vmem:[#allocation2 + $0x48] sm:$0xf] %vm316_vm0, %v1161_v37 }
  0xb9   : > { %1407 = vmatpush3.bf16.msra.mxu1 %v1406_v41  ;;  %v685_v43 = vpop.permute.xlu1 %684  ;;  %v744_v47 = vld [vmem:[#allocation2] sm:$0xff] }
  0xba   : > { %v570_v44 = vpop.permute.xlu0 %569  ;;  %1408 = vmatprep.subr.bf16.mxu1 %v1521_v3  ;;  %v586_v46 = vld [vmem:[#allocation2 + $0x58] sm:$0xff]  ;;  %689 = vst.msk [vmem:[#allocation2 + $0x1c] sm:$0xff] %vm323_vm2, %v685_v43 }
  0xbb   : > { %574 = vst.msk [vmem:[#allocation2 + $0x64] sm:$0xff] %vm323_vm2, %v570_v44  ;;  %v1409_v48 = vpack.c.bf16 %v586_v46, %v585_v45 }
  0xbc   : > { %834 = vst.msk [vmem:[#allocation2] sm:$0xf] %vm316_vm0, %v1169_v42 }
  0xbd   : > { %1410 = vmatpush3.bf16.msra.mxu1 %v1409_v48  ;;  %v838_v49 = vpop.permute.xlu1 %837 }
  0xbe   : > { %v696_v50 = vpop.permute.xlu0 %695  ;;  %v745_v51 = vld [vmem:[#allocation2 + $0x8] sm:$0xff]  ;;  %1411 = vmatprep.subr.bf16.mxu1 %v1521_v3  ;;  %v746_v53 = vld [vmem:[#allocation2 + $0x10] sm:$0xff] }
  0xbf   : > { %698 = vst.msk [vmem:[#allocation2 + $0x28] sm:$0xff] %vm323_vm2, %v696_v50  ;;  %v1416_v52 = vpack.c.bf16 %v745_v51, %v744_v47  ;;  %840 = vst.msk [vmem:[#allocation2 + $0x4] sm:$0xff] %vm323_vm2, %v838_v49 }
  0xc1   : > { %1417 = vmatpush3.bf16.msra.mxu0 %v1416_v52  ;;  %v702_v55 = vpop.permute.xlu1 %701  ;;  %v747_v59 = vld [vmem:[#allocation2 + $0x18] sm:$0xff]  ;;  %v748_v62 = vld [vmem:[#allocation2 + $0x20] sm:$0xff] }
  0xc2   : > { %v844_v56 = vpop.permute.xlu0 %843  ;;  %1418 = vmatprep.subr.bf16.mxu0 %v1521_v3  ;;  %v587_v57 = vld [vmem:[#allocation2 + $0x60] sm:$0xff]  ;;  %v588_v58 = vld [vmem:[#allocation2 + $0x68] sm:$0xf]  ;;  %704 = vst.msk [vmem:[#allocation2 + $0x30] sm:$0xff] %vm323_vm2, %v702_v55  ;;  %v1419_v61 = vpack.c.bf16 %v747_v59, %v746_v53 }
  0xc3   : > { %v1412_v60 = vpack.c.bf16 %v588_v58, %v587_v57  ;;  %846 = vst.msk [vmem:[#allocation2 + $0xc] sm:$0xff] %vm323_vm2, %v844_v56 }
  0xc4   : > { %861 = vst.msk [vmem:[#allocation2 + $0x24] sm:$0xf] %vm316_vm0, %v1174_v54 }
  0xc5   : > { %1414 = vmatpush3.bf16.msk.msra.mxu1 %vm1715_vm5, %v1412_v60  ;;  %1420 = vmatpush3.bf16.msra.mxu0 %v1419_v61  ;;  %v852_v63 = vpop.permute.xlu1 %851 }
  0xc6   : > { %v710_v0 = vpop.permute.xlu0 %709  ;;  %1421 = vmatprep.subr.bf16.mxu0 %v1521_v3  ;;  %v749_v1 = vld [vmem:[#allocation2 + $0x28] sm:$0xff]  ;;  %1437 = vmatprep.subr.bf16.mxu1 %v1521_v3  ;;  %857 = vst.msk [vmem:[#allocation2 + $0x14] sm:$0xff] %vm323_vm2, %v852_v63  ;;  %v912_v4 = vld [vmem:[#allocation2] sm:$0xff] }
  0xc7   : > { %715 = vst.msk [vmem:[#allocation2 + $0x38] sm:$0xff] %vm323_vm2, %v710_v0  ;;  %v1422_v2 = vpack.c.bf16 %v749_v1, %v748_v62 }
  0xc8   : > { %1307 = vmatmul.mubr.msk.f32.vlgmr.msra.gmra.mrb[0].mxu1 %vm416_vm6, %v1727_v31 }
  0xc9   : > { %1423 = vmatpush3.bf16.msra.mxu0 %v1422_v2  ;;  %1368 = vmatprep.mubr.msk.f32.mxu1 %vm1523_vm1, %v1524_v19  ;;  %v712_v5 = vpop.permute.xlu1 %711  ;;  %v750_v9 = vld [vmem:[#allocation2 + $0x30] sm:$0xff] }
  0xca   : > { %v854_v6 = vpop.permute.xlu0 %853  ;;  %v913_v7 = vld [vmem:[#allocation2 + $0x8] sm:$0xff]  ;;  %1424 = vmatprep.subr.bf16.mxu0 %v1521_v3  ;;  %716 = vst.msk [vmem:[#allocation2 + $0x40] sm:$0xff] %vm323_vm2, %v712_v5 }
  0xcb   : > { %858 = vst.msk [vmem:[#allocation2 + $0x1c] sm:$0xff] %vm323_vm2, %v854_v6  ;;  %v1438_v8 = vpack.c.bf16 %v913_v7, %v912_v4 }
  0xcd   : > { %1439 = vmatpush3.bf16.msra.mxu1 %v1438_v8  ;;  %v729_v10 = vpop.permute.xlu1 %728  ;;  %v914_v15 = vld [vmem:[#allocation2 + $0x10] sm:$0xff] }
  0xce   : > { %v723_v11 = vpop.permute.xlu0 %722  ;;  %v751_v12 = vld [vmem:[#allocation2 + $0x38] sm:$0xff]  ;;  %1440 = vmatprep.subr.bf16.mxu1 %v1521_v3  ;;  %731 = vst.msk [vmem:[#allocation2 + $0x54] sm:$0xff] %vm323_vm2, %v729_v10 }
  0xcf   : > { %725 = vst.msk [vmem:[#allocation2 + $0x4c] sm:$0xff] %vm323_vm2, %v723_v11  ;;  %v1425_v19 = vpack.c.bf16 %v751_v12, %v750_v9 }
  0xd1   : > { %1426 = vmatpush3.bf16.msra.mxu0 %v1425_v19  ;;  %v737_v13 = vpop.permute.xlu1 %736  ;;  %v752_v20 = vld [vmem:[#allocation2 + $0x40] sm:$0xff] }
  0xd2   : > { %v865_v14 = vpop.permute.xlu0 %864  ;;  %v915_v16 = vld [vmem:[#allocation2 + $0x18] sm:$0xff]  ;;  %1427 = vmatprep.subr.bf16.mxu0 %v1521_v3  ;;  %742 = vst.msk [vmem:[#allocation2 + $0x5c] sm:$0xff] %vm323_vm2, %v737_v13  ;;  %v916_v25 = vld [vmem:[#allocation2 + $0x20] sm:$0xff] }
  0xd3   : > { %867 = vst.msk [vmem:[#allocation2 + $0x28] sm:$0xff] %vm323_vm2, %v865_v14  ;;  %v1441_v17 = vpack.c.bf16 %v915_v16, %v914_v15 }
  0xd5   : > { %1442 = vmatpush3.bf16.msra.mxu1 %v1441_v17  ;;  %v871_v21 = vpop.permute.xlu1 %870 }
  0xd6   : > { %v739_v22 = vpop.permute.xlu0 %738  ;;  %v753_v23 = vld [vmem:[#allocation2 + $0x48] sm:$0xff]  ;;  %1443 = vmatprep.subr.bf16.mxu1 %v1521_v3  ;;  %873 = vst.msk [vmem:[#allocation2 + $0x30] sm:$0xff] %vm323_vm2, %v871_v21  ;;  %v754_v29 = vld [vmem:[#allocation2 + $0x50] sm:$0xff] }
  0xd7   : > { %743 = vst.msk [vmem:[#allocation2 + $0x64] sm:$0xff] %vm323_vm2, %v739_v22  ;;  %v1428_v24 = vpack.c.bf16 %v753_v23, %v752_v20 }
  0xd8   : > { %887 = vst.msk [vmem:[#allocation2 + $0x48] sm:$0xf] %vm316_vm0, %v886_v18 }
  0xd9   : > { %1429 = vmatpush3.bf16.msra.mxu0 %v1428_v24  ;;  %v881_v26 = vpop.permute.xlu1 %880  ;;  %v755_v30 = vld [vmem:[#allocation2 + $0x58] sm:$0xff] }
  0xda   : > { %v879_v27 = vpop.permute.xlu0 %878  ;;  %1430 = vmatprep.subr.bf16.mxu0 %v1521_v3  ;;  %v917_v32 = vld [vmem:[#allocation2 + $0x28] sm:$0xff]  ;;  %885 = vst.msk [vmem:[#allocation2 + $0x40] sm:$0xff] %vm323_vm2, %v881_v26  ;;  %v1431_v33 = vpack.c.bf16 %v755_v30, %v754_v29 }
  0xdb   : > { %884 = vst.msk [vmem:[#allocation2 + $0x38] sm:$0xff] %vm323_vm2, %v879_v27  ;;  %v1444_v34 = vpack.c.bf16 %v917_v32, %v916_v25 }
  0xdd   : > { %1432 = vmatpush3.bf16.msra.mxu0 %v1431_v33  ;;  %1445 = vmatpush3.bf16.msra.mxu1 %v1444_v34  ;;  %v897_v35 = vpop.permute.xlu1 %896  ;;  %v918_v40 = vld [vmem:[#allocation2 + $0x30] sm:$0xff] }
  0xde   : > { %v891_v36 = vpop.permute.xlu0 %890  ;;  %1433 = vmatprep.subr.bf16.mxu0 %v1521_v3  ;;  %v756_v37 = vld [vmem:[#allocation2 + $0x60] sm:$0xff]  ;;  %v757_v38 = vld [vmem:[#allocation2 + $0x68] sm:$0xf]  ;;  %1446 = vmatprep.subr.bf16.mxu1 %v1521_v3  ;;  %899 = vst.msk [vmem:[#allocation2 + $0x54] sm:$0xff] %vm323_vm2, %v897_v35 }
  0xdf   : > { %893 = vst.msk [vmem:[#allocation2 + $0x4c] sm:$0xff] %vm323_vm2, %v891_v36  ;;  %v1434_v39 = vpack.c.bf16 %v757_v38, %v756_v37 }
  0xe1   : > { %1436 = vmatpush3.bf16.msk.msra.mxu0 %vm1715_vm5, %v1434_v39  ;;  %v907_v41 = vpop.permute.xlu1 %906  ;;  %v920_v45 = vld [vmem:[#allocation2 + $0x40] sm:$0xff] }
  0xe2   : > { %v905_v42 = vpop.permute.xlu0 %904  ;;  %v919_v43 = vld [vmem:[#allocation2 + $0x38] sm:$0xff]  ;;  %911 = vst.msk [vmem:[#allocation2 + $0x64] sm:$0xff] %vm323_vm2, %v907_v41 }
  0xe3   : > { %910 = vst.msk [vmem:[#allocation2 + $0x5c] sm:$0xff] %vm323_vm2, %v905_v42  ;;  %v1447_v44 = vpack.c.bf16 %v919_v43, %v918_v40 }
  0xe4   : > { %1338 = vmatmul.mubr.msk.f32.vlgmr.msra.gmra.mrb[2].mxu0 %vm416_vm6, %v1727_v31 }
  0xe5   : > { %1448 = vmatpush3.bf16.msra.mxu1 %v1447_v44 }
  0xe6   : > { %1449 = vmatprep.subr.bf16.mxu1 %v1521_v3  ;;  %v921_v46 = vld [vmem:[#allocation2 + $0x48] sm:$0xff]  ;;  %v922_v48 = vld [vmem:[#allocation2 + $0x50] sm:$0xff] }
  0xe7   : > { %v1450_v47 = vpack.c.bf16 %v921_v46, %v920_v45 }
  0xe9   : > { %1451 = vmatpush3.bf16.msra.mxu1 %v1450_v47  ;;  %v925_v52 = vld [vmem:[#allocation2 + $0x68] sm:$0xf] }
  0xea   : > { %1452 = vmatprep.subr.bf16.mxu1 %v1521_v3  ;;  %v923_v49 = vld [vmem:[#allocation2 + $0x58] sm:$0xff]  ;;  %v924_v51 = vld [vmem:[#allocation2 + $0x60] sm:$0xff] }
  0xeb   : > { %v1453_v50 = vpack.c.bf16 %v923_v49, %v922_v48  ;;  %v1456_v53 = vpack.c.bf16 %v925_v52, %v924_v51 }
  0xed   : > { %1454 = vmatpush3.bf16.msra.mxu1 %v1453_v50 }
  0xee   : > { %1455 = vmatprep.subr.bf16.mxu1 %v1521_v3 }
  0xf1   : > { %1458 = vmatpush3.bf16.msk.msra.mxu1 %vm1715_vm5, %v1456_v53 }
  0xf3   : > { %v414_v54 = vpop.permute.xlu0 %413 }
  0xf4   : > { %1369 = vmatmul.mubr.msk.f32.vlgmr.msra.gmra.mrb[2].mxu1 %vm416_vm6, %v1727_v31 }
 0x187   : > { %v490_v55 = vpop.f32.mrb[0].mxu0 }
 0x188   : > { %v491_v56 = vadd.f32 %v490_v55, %v414_v54  ;;  %v1277_v57 = vpop.f32.mrb[1].mxu0 }
 0x18a   : > { %494 = vst.msk [vmem:[%s311_s11] sm:$0xff] %vm323_vm2, %v491_v56 }
 0x19b   : > { %v658_v58 = vpop.f32.mrb[0].mxu1 }
 0x19c   : > { %v659_v3 = vadd.f32 %v658_v58, %v414_v54  ;;  %v1308_v59 = vpop.f32.mrb[1].mxu1 }
 0x19e   : > { %1150 = vst.msk [vmem:[%s311_s11 + $0x8] sm:$0xff] %vm323_vm2, %v659_v3 }
 0x1b7   : > { %v827_v28 = vpop.f32.mrb[2].mxu0 }
 0x1b8   : > { %v828_v60 = vadd.f32 %v827_v28, %v414_v54  ;;  %v1339_v61 = vpop.f32.mrb[3].mxu0 }
 0x1ba   : > { %1168 = vst.msk [vmem:[%s311_s11 + $0x10] sm:$0xff] %vm323_vm2, %v828_v60 }
 0x1c7   : > { %v995_v31 = vpop.f32.mrb[2].mxu1 }
 0x1c8   : > { %v996_v62 = vadd.f32 %v995_v31, %v414_v54  ;;  %v1370_v63 = vpop.f32.mrb[3].mxu1 }
 0x1ca   : > { %1181 = vst.msk [vmem:[%s311_s11 + $0x18] sm:$0xff] %vm323_vm2, %v996_v62 }
 0x1cb PF: > { %s14_s17 = sadd.s32 1, %s1517_s17   ;;  %s1822_s15 = smov %s1513_s16 }
 0x1cc   : > { %p11_p5 = scmp.ge.s32.totalorder %s14_s17, 4   ;;  %s1823_s16 = smov %s1825_s18 }
 0x1ce   :  { %13 = sbr.rel (!%p11_p5) target bundleno = 2 (0x2), region = 79 }

</bundles_post_ra>
